<compile_context>
chip_gen: v7x
topology: tpu7x:2x2x1
jax: 0.10.0
libtpu: 0.0.40
codegen_flags: <defaults>
</compile_context>

<pallas_src>
import jax
import jax.numpy as jnp
from jax.experimental import pallas as pl
from jax.experimental.pallas import tpu as pltpu

# ---- Model config (ConvRNN(seqlen=SEQLEN, dim=DIM, hidden_size=H, out_size=OUT,
#                            hidden_neurons=[CCONV], bidirectional=True, channel=True)) ----
B = 2
SEQLEN = 16                # the "C" axis of the (B, C, T) PyTorch input
DIM = 4                    # the "T" axis of the (B, C, T) PyTorch input
CCONV = 8                  # hidden_neurons[0]
K = 3                      # conv kernel size
H = 32                     # LSTM hidden size
OUT = 1                    # out_size
L_OUT = SEQLEN - (K - 1)   # conv output length (stride 1, pad 0, dilation 1)
GATES = 8 * H              # 4 gates x 2 directions, fused (=256)
BG = 8                     # batch rows per grid step (one sublane tile)
KC = K * 2 * DIM           # im2col feature width (fwd | time-reversed input, all K taps)


def convrnn_kernel(xcol_ref, weff_ref, beff_ref, whh_ref, wlin_ref, blin_ref,
                   out_ref, gx_ref):
    # xcol_ref : (L_OUT*BG, KC)     this group's im2col'd input (fwd | reversed), step-major
    # weff_ref : (KC, GATES)        conv taps folded through Wih, both dirs, i/f/o pre-scaled
    # beff_ref : (1, GATES)         bconv@Wih + bih + bhh, both dirs, i/f/o pre-scaled
    # whh_ref  : (2*H, GATES)       block-diagonal recurrent weight [h_f | h_b], i/f/o scaled
    # wlin_ref : (L_OUT, 1, 2*H)    final Linear rows re-ordered to merged-step h layout
    # blin_ref : (1, OUT)           final Linear bias
    # out_ref  : (BG, OUT)
    # gx_ref   : (L_OUT*BG, GATES)  scratch: precomputed x-side gate pre-activations

    # ---------- phase 1: conv + LSTM input projection, all steps & both dirs, ONE matmul --
    gx_ref[...] = jnp.dot(xcol_ref[...], weff_ref[...],
                          preferred_element_type=jnp.float32) + beff_ref[...]

    # ---------- phase 2: merged fwd+bwd LSTM recurrence, fully unrolled ----------
    h = jnp.zeros((BG, 2 * H), jnp.float32)      # [h_fwd | h_bwd]  (values in vregs)
    c = jnp.zeros((BG, 2 * H), jnp.float32)      # [c_fwd | c_bwd]
    acc = jnp.zeros((BG, 2 * H), jnp.float32)    # running Linear accumulator (VPU)

    S3 = 3 * 2 * H                               # 192 contiguous lanes: i | f | o
    for s in range(L_OUT):                       # static unroll: one basic block
        # fwd direction at time s, bwd direction at time L_OUT-1-s (gx rows already carry
        # the matching pre-activations).  Full-tile (8,256) load + ONE (8,64)@(64,256) MXU op.
        gates = gx_ref[s * BG:(s + 1) * BG, :] + jnp.dot(
            h, whh_ref[...], preferred_element_type=jnp.float32)
        t = jnp.tanh(gates)                      # ONE wide EUP transcendental per step
        sig = 0.5 * t[:, :S3] + 0.5              # sigmoid(x): x/2 already folded into W/b
        i_g = sig[:, 0 * 2 * H:1 * 2 * H]
        f_g = sig[:, 1 * 2 * H:2 * 2 * H]
        o_g = sig[:, 2 * 2 * H:3 * 2 * H]
        g_g = t[:, S3:]
        c = f_g * c + i_g * g_g
        h = o_g * jnp.tanh(c)
        # Final-Linear contribution for this step: pure VPU FMA off the MXU path.
        # Exact because OUT == 1 (per-output accumulator would be needed otherwise).
        acc = acc + h * wlin_ref[s]

    out_ref[...] = jnp.sum(acc, axis=-1, keepdims=True) + blin_ref[...]


def _prep_params(params):
    """Weight-only folding / re-layout (constant w.r.t. the input)."""
    (w_conv, b_conv, wih_f, whh_f, bih_f, bhh_f,
     wih_b, whh_b, bih_b, bhh_b, w_lin, b_lin) = params

    # Gate re-order PyTorch [i,f,g,o] -> fused [i,f,o,g] (i/f/o contiguous for the post-tanh
    # affine), and fold sigmoid's x/2 pre-scale into the i/f/o gate weights & biases.
    perm = jnp.array([0, 1, 3, 2])
    gscale = jnp.array([0.5, 0.5, 0.5, 1.0], jnp.float32)

    def gates_in(w):          # (4H, IN) -> (4, IN, H), reordered + scaled
        wg = jnp.transpose(w.reshape(4, H, -1), (0, 2, 1))
        return wg[perm] * gscale[:, None, None]

    def gates_b(b):           # (4H,) -> (4, H), reordered + scaled
        return b.reshape(4, H)[perm] * gscale[:, None]

    wih_f_g = gates_in(wih_f)                 # (4, CCONV, H)
    wih_b_g = gates_in(wih_b)
    whh_f_g = gates_in(whh_f)                 # (4, H, H)
    whh_b_g = gates_in(whh_b)
    b_f_g = gates_b(bih_f + bhh_f)            # (4, H)
    b_b_g = gates_b(bih_b + bhh_b)

    wconv_t = jnp.transpose(w_conv, (2, 1, 0))                       # (K, DIM, CCONV)

    # Fold conv taps through the input projection (no activation between conv and LSTM).
    # Fused gate-column layout: [gate, direction, H] -> gate*2H + dir*H + h.
    weff_f = jnp.einsum('kdc,gch->kdgh', wconv_t, wih_f_g)           # (K, DIM, 4, H)
    weff_b = jnp.einsum('kdc,gch->kdgh', wconv_t[::-1], wih_b_g)     # tap K-1-k at slot k
    weff = jnp.zeros((K, 2, DIM, 4, 2, H), jnp.float32)
    weff = weff.at[:, 0, :, :, 0, :].set(weff_f)                     # cols 0:DIM  = fwd x
    weff = weff.at[:, 1, :, :, 1, :].set(weff_b)                     # cols DIM:   = rev x
    weff = weff.reshape(KC, GATES)                                   # single im2col matmul

    bxf = jnp.einsum('c,gch->gh', b_conv, wih_f_g) + b_f_g
    bxb = jnp.einsum('c,gch->gh', b_conv, wih_b_g) + b_b_g
    beff = jnp.stack([bxf, bxb], axis=1).reshape(1, GATES)

    # Block-diagonal recurrent weight: rows [h_fwd | h_bwd], cols [gate, dir, H].
    whh_bd = jnp.zeros((2, H, 4, 2, H), jnp.float32)
    whh_bd = whh_bd.at[0, :, :, 0, :].set(jnp.transpose(whh_f_g, (1, 0, 2)))
    whh_bd = whh_bd.at[1, :, :, 1, :].set(jnp.transpose(whh_b_g, (1, 0, 2)))
    whh_bd = whh_bd.reshape(2 * H, GATES)

    # Final Linear, re-ordered so step s of the merged loop (h_fwd(s) | h_bwd(L_OUT-1-s))
    # multiplies the matching slice of the PyTorch (OUT, L_OUT*2H) weight; laid out as
    # (L_OUT, 1, 2H) for the in-loop VPU FMA.
    wl = w_lin.reshape(OUT, L_OUT, 2, H)
    wm_f = wl[:, :, 0, :]                 # weight for h_fwd at time s
    wm_b = wl[:, ::-1, 1, :]              # weight for h_bwd at time L_OUT-1-s
    wlin_m = jnp.transpose(jnp.stack([wm_f, wm_b], axis=2),
                           (1, 0, 2, 3)).reshape(L_OUT, OUT, 2 * H)
    blin2 = b_lin.reshape(1, OUT)
    return weff, beff, whh_bd, wlin_m, blin2


@jax.jit
def convrnn_forward(x, params):
    weff, beff, whh_bd, wlin_m, blin2 = _prep_params(params)

    # ---- input glue: layout plumbing only (transpose / reverse / concat / im2col / pad) ----
    bx = x.shape[0]
    ng = pl.cdiv(bx, BG)                                     # grid groups of 8 batch rows
    bp = ng * BG
    x_tm = jnp.transpose(x, (1, 0, 2))                       # (SEQLEN, B, DIM)
    x_comb = jnp.concatenate([x_tm, x_tm[::-1]], axis=-1)    # fwd | time-reversed
    x_comb = jnp.pad(x_comb, ((0, 0), (0, bp - bx), (0, 0)))  # pad batch to sublane tile
    cols = jnp.stack([x_comb[k:k + L_OUT] for k in range(K)], axis=2)   # (L_OUT, bp, K, 2D)
    xcol = jnp.transpose(cols.reshape(L_OUT, ng, BG, KC), (1, 0, 2, 3))
    xcol = xcol.reshape(ng, L_OUT * BG, KC)                  # group-major, step-major rows

    out = pl.pallas_call(
        convrnn_kernel,
        out_shape=jax.ShapeDtypeStruct((ng, BG, OUT), jnp.float32),
        grid=(ng,),
        in_specs=[
            # per-group input block
            pl.BlockSpec((None, L_OUT * BG, KC), lambda g: (g, 0, 0)),
            # weights: constant block index -> VMEM-resident across all grid steps
            pl.BlockSpec((KC, GATES), lambda g: (0, 0)),
            pl.BlockSpec((1, GATES), lambda g: (0, 0)),
            pl.BlockSpec((2 * H, GATES), lambda g: (0, 0)),
            pl.BlockSpec((L_OUT, 1, 2 * H), lambda g: (0, 0, 0)),
            pl.BlockSpec((1, OUT), lambda g: (0, 0)),
        ],
        out_specs=pl.BlockSpec((None, BG, OUT), lambda g: (g, 0, 0)),
        scratch_shapes=[
            pltpu.VMEM((L_OUT * BG, GATES), jnp.float32),    # precomputed gate x-terms
        ],
        compiler_params=pltpu.CompilerParams(
            dimension_semantics=("parallel",)),              # groups shard across TCs (v7x)
    )(xcol, weff, beff, whh_bd, wlin_m, blin2)
    return out.reshape(bp, OUT)[:bx]


def reference_forward(x, params):
    """Pure-JAX reference mirroring the PyTorch forward exactly."""
    (w_conv, b_conv, wih_f, whh_f, bih_f, bhh_f,
     wih_b, whh_b, bih_b, bhh_b, w_lin, b_lin) = params
    xp = jnp.transpose(x, (0, 2, 1))                     # permute([0,2,1]) -> (B, DIM, SEQLEN)
    conv = []
    for l in range(L_OUT):
        seg = xp[:, :, l:l + K]                          # (B, DIM, K)
        conv.append(jnp.einsum('bck,ock->bo', seg, w_conv) + b_conv)
    conv = jnp.stack(conv, axis=1)                       # permute back -> (B, L_OUT, CCONV)

    def run_dir(wih, whh, bih, bhh, reverse):
        h = jnp.zeros((B, H), jnp.float32)
        c = jnp.zeros((B, H), jnp.float32)
        hs = [None] * L_OUT
        order = range(L_OUT - 1, -1, -1) if reverse else range(L_OUT)
        for t in order:
            gates = conv[:, t, :] @ wih.T + h @ whh.T + bih + bhh
            i = jax.nn.sigmoid(gates[:, :H])
            f = jax.nn.sigmoid(gates[:, H:2 * H])
            g = jnp.tanh(gates[:, 2 * H:3 * H])
            o = jax.nn.sigmoid(gates[:, 3 * H:])
            c = f * c + i * g
            h = o * jnp.tanh(c)
            hs[t] = h
        return jnp.stack(hs, axis=1)                     # (B, L_OUT, H)

    hf = run_dir(wih_f, whh_f, bih_f, bhh_f, reverse=False)
    hb = run_dir(wih_b, whh_b, bih_b, bhh_b, reverse=True)
    out_seq = jnp.concatenate([hf, hb], axis=-1)         # (B, L_OUT, 2H)
    flat = out_seq.reshape(B, L_OUT * 2 * H)             # flatten(1)
    return flat @ w_lin.T + b_lin


if __name__ == "__main__":
    key = jax.random.PRNGKey(0)
    keys = jax.random.split(key, 13)
    x = jax.random.normal(keys[0], (B, SEQLEN, DIM), jnp.float32)

    # Deterministic synthetic parameters (PyTorch shapes)
    w_conv = 0.2 * jax.random.normal(keys[1], (CCONV, DIM, K), jnp.float32)
    b_conv = 0.1 * jax.random.normal(keys[2], (CCONV,), jnp.float32)
    wih_f = 0.2 * jax.random.normal(keys[3], (4 * H, CCONV), jnp.float32)
    whh_f = 0.2 * jax.random.normal(keys[4], (4 * H, H), jnp.float32)
    bih_f = 0.1 * jax.random.normal(keys[5], (4 * H,), jnp.float32)
    bhh_f = 0.1 * jax.random.normal(keys[6], (4 * H,), jnp.float32)
    wih_b = 0.2 * jax.random.normal(keys[7], (4 * H, CCONV), jnp.float32)
    whh_b = 0.2 * jax.random.normal(keys[8], (4 * H, H), jnp.float32)
    bih_b = 0.1 * jax.random.normal(keys[9], (4 * H,), jnp.float32)
    bhh_b = 0.1 * jax.random.normal(keys[10], (4 * H,), jnp.float32)
    w_lin = 0.05 * jax.random.normal(keys[11], (OUT, L_OUT * 2 * H), jnp.float32)
    b_lin = 0.1 * jax.random.normal(keys[12], (OUT,), jnp.float32)
    params = (w_conv, b_conv, wih_f, whh_f, bih_f, bhh_f,
              wih_b, whh_b, bih_b, bhh_b, w_lin, b_lin)

    out = convrnn_forward(x, params)
    out = jax.block_until_ready(out)
    assert out.shape == (B, OUT)

    ref = reference_forward(x, params)
    if not jnp.allclose(out, ref, atol=1e-3, rtol=1e-3):
        raise AssertionError(f"kernel/reference mismatch:\n{out}\nvs\n{ref}")

    print("KERNEL_OK")
</pallas_src>

<mosaic_0001>
module attributes {stable_mosaic.version = 11 : i64} {
  func.func @convrnn_kernel(%arg0: i32, %arg1: memref<1x112x24xf32, #tpu.memory_space<vmem>>, %arg2: memref<24x256xf32, #tpu.memory_space<vmem>>, %arg3: memref<1x256xf32, #tpu.memory_space<vmem>>, %arg4: memref<64x256xf32, #tpu.memory_space<vmem>>, %arg5: memref<14x1x64xf32, #tpu.memory_space<vmem>>, %arg6: memref<1x1xf32, #tpu.memory_space<vmem>>, %arg7: memref<1x8x1xf32, #tpu.memory_space<vmem>>, %arg8: memref<112x256xf32, #tpu.memory_space<vmem>>) attributes {dimension_semantics = [#tpu.dimension_semantics<parallel>], iteration_bounds = array<i64: 1>, scalar_prefetch = 0 : i64, scratch_operands = 1 : i64, tpu.core_type = #tpu.core_type<tc>, window_params = [{transform_indices = @transform_0, window_bounds = array<i64: 1, 112, 24>}, {pipeline_mode = #tpu.pipeline_mode<synchronous>, transform_indices = @transform_1, window_bounds = array<i64: 24, 256>}, {pipeline_mode = #tpu.pipeline_mode<synchronous>, transform_indices = @transform_2, window_bounds = array<i64: 1, 256>}, {pipeline_mode = #tpu.pipeline_mode<synchronous>, transform_indices = @transform_3, window_bounds = array<i64: 64, 256>}, {pipeline_mode = #tpu.pipeline_mode<synchronous>, transform_indices = @transform_4, window_bounds = array<i64: 14, 1, 64>}, {pipeline_mode = #tpu.pipeline_mode<synchronous>, transform_indices = @transform_5, window_bounds = array<i64: 1, 1>}, {transform_indices = @transform_6, window_bounds = array<i64: 1, 8, 1>}]} {
    %c0 = arith.constant 0 : index
    %c0_0 = arith.constant 0 : index
    %c0_1 = arith.constant 0 : index
    %0 = vector.load %arg1[%c0, %c0_0, %c0_1] : memref<1x112x24xf32, #tpu.memory_space<vmem>>, vector<1x112x24xf32>
    %1 = vector.shape_cast %0 : vector<1x112x24xf32> to vector<112x24xf32>
    %c0_2 = arith.constant 0 : index
    %c0_3 = arith.constant 0 : index
    %2 = vector.load %arg2[%c0_2, %c0_3] : memref<24x256xf32, #tpu.memory_space<vmem>>, vector<24x256xf32>
    %cst = arith.constant dense<0.000000e+00> : vector<112x256xf32>
    %3 = tpu.matmul %1, %2, %cst {dimension_numbers = #tpu.dot_dimension_numbers<[1], [0], [0], [1], [0, 0, 1, 1], [], []>} : vector<112x24xf32>, vector<24x256xf32>, vector<112x256xf32> -> vector<112x256xf32>
    %c0_4 = arith.constant 0 : index
    %c0_5 = arith.constant 0 : index
    %4 = vector.load %arg3[%c0_4, %c0_5] : memref<1x256xf32, #tpu.memory_space<vmem>>, vector<1x256xf32>
    %5 = vector.broadcast %4 : vector<1x256xf32> to vector<112x256xf32>
    %6 = arith.addf %3, %5 : vector<112x256xf32>
    %c0_6 = arith.constant 0 : index
    %c0_7 = arith.constant 0 : index
    %7 = vector.load %arg8[%c0_6, %c0_7] : memref<112x256xf32, #tpu.memory_space<vmem>>, vector<112x256xf32>
    tpu.vector_store %arg8[%c0_6, %c0_7], %6 {strides = array<i32>} : memref<112x256xf32, #tpu.memory_space<vmem>>, vector<112x256xf32>,
    %cst_8 = arith.constant 0.000000e+00 : f32
    %8 = vector.broadcast %cst_8 : f32 to vector<8x64xf32>
    %cst_9 = arith.constant 0.000000e+00 : f32
    %9 = vector.broadcast %cst_9 : f32 to vector<8x64xf32>
    %cst_10 = arith.constant 0.000000e+00 : f32
    %10 = vector.broadcast %cst_10 : f32 to vector<8x64xf32>
    %c0_11 = arith.constant 0 : index
    %c0_12 = arith.constant 0 : index
    %11 = vector.load %arg8[%c0_11, %c0_12] : memref<112x256xf32, #tpu.memory_space<vmem>>, vector<8x256xf32>
    %c0_13 = arith.constant 0 : index
    %c0_14 = arith.constant 0 : index
    %12 = vector.load %arg4[%c0_13, %c0_14] : memref<64x256xf32, #tpu.memory_space<vmem>>, vector<64x256xf32>
    %cst_15 = arith.constant dense<0.000000e+00> : vector<8x256xf32>
    %13 = tpu.matmul %8, %12, %cst_15 {dimension_numbers = #tpu.dot_dimension_numbers<[1], [0], [0], [1], [0, 0, 1, 1], [], []>} : vector<8x64xf32>, vector<64x256xf32>, vector<8x256xf32> -> vector<8x256xf32>
    %14 = arith.addf %11, %13 : vector<8x256xf32>
    %15 = math.tanh %14 : vector<8x256xf32>
    %16 = vector.extract_strided_slice %15 {offsets = [0, 0], sizes = [8, 192], strides = [1, 1]} : vector<8x256xf32> to vector<8x192xf32>
    %cst_16 = arith.constant 5.000000e-01 : f32
    %17 = vector.broadcast %cst_16 : f32 to vector<8x192xf32>
    %18 = arith.mulf %17, %16 : vector<8x192xf32>
    %cst_17 = arith.constant 5.000000e-01 : f32
    %19 = vector.broadcast %cst_17 : f32 to vector<8x192xf32>
    %20 = arith.addf %18, %19 : vector<8x192xf32>
    %21 = vector.extract_strided_slice %20 {offsets = [0, 0], sizes = [8, 64], strides = [1, 1]} : vector<8x192xf32> to vector<8x64xf32>
    %22 = vector.extract_strided_slice %20 {offsets = [0, 64], sizes = [8, 64], strides = [1, 1]} : vector<8x192xf32> to vector<8x64xf32>
    %23 = vector.extract_strided_slice %20 {offsets = [0, 128], sizes = [8, 64], strides = [1, 1]} : vector<8x192xf32> to vector<8x64xf32>
    %24 = vector.extract_strided_slice %15 {offsets = [0, 192], sizes = [8, 64], strides = [1, 1]} : vector<8x256xf32> to vector<8x64xf32>
    %25 = arith.mulf %22, %9 : vector<8x64xf32>
    %26 = arith.mulf %21, %24 : vector<8x64xf32>
    %27 = arith.addf %25, %26 : vector<8x64xf32>
    %28 = math.tanh %27 : vector<8x64xf32>
    %29 = arith.mulf %23, %28 : vector<8x64xf32>
    %c0_18 = arith.constant 0 : index
    %c0_19 = arith.constant 0 : index
    %c0_20 = arith.constant 0 : index
    %30 = vector.load %arg5[%c0_18, %c0_19, %c0_20] : memref<14x1x64xf32, #tpu.memory_space<vmem>>, vector<1x1x64xf32>
    %31 = vector.shape_cast %30 : vector<1x1x64xf32> to vector<1x64xf32>
    %32 = vector.broadcast %31 : vector<1x64xf32> to vector<8x64xf32>
    %33 = arith.mulf %29, %32 : vector<8x64xf32>
    %34 = arith.addf %10, %33 : vector<8x64xf32>
    %c8 = arith.constant 8 : index
    %c0_21 = arith.constant 0 : index
    %35 = vector.load %arg8[%c8, %c0_21] : memref<112x256xf32, #tpu.memory_space<vmem>>, vector<8x256xf32>
    %c0_22 = arith.constant 0 : index
    %c0_23 = arith.constant 0 : index
    %36 = vector.load %arg4[%c0_22, %c0_23] : memref<64x256xf32, #tpu.memory_space<vmem>>, vector<64x256xf32>
    %cst_24 = arith.constant dense<0.000000e+00> : vector<8x256xf32>
    %37 = tpu.matmul %29, %36, %cst_24 {dimension_numbers = #tpu.dot_dimension_numbers<[1], [0], [0], [1], [0, 0, 1, 1], [], []>} : vector<8x64xf32>, vector<64x256xf32>, vector<8x256xf32> -> vector<8x256xf32>
    %38 = arith.addf %35, %37 : vector<8x256xf32>
    %39 = math.tanh %38 : vector<8x256xf32>
    %40 = vector.extract_strided_slice %39 {offsets = [0, 0], sizes = [8, 192], strides = [1, 1]} : vector<8x256xf32> to vector<8x192xf32>
    %cst_25 = arith.constant 5.000000e-01 : f32
    %41 = vector.broadcast %cst_25 : f32 to vector<8x192xf32>
    %42 = arith.mulf %41, %40 : vector<8x192xf32>
    %cst_26 = arith.constant 5.000000e-01 : f32
    %43 = vector.broadcast %cst_26 : f32 to vector<8x192xf32>
    %44 = arith.addf %42, %43 : vector<8x192xf32>
    %45 = vector.extract_strided_slice %44 {offsets = [0, 0], sizes = [8, 64], strides = [1, 1]} : vector<8x192xf32> to vector<8x64xf32>
    %46 = vector.extract_strided_slice %44 {offsets = [0, 64], sizes = [8, 64], strides = [1, 1]} : vector<8x192xf32> to vector<8x64xf32>
    %47 = vector.extract_strided_slice %44 {offsets = [0, 128], sizes = [8, 64], strides = [1, 1]} : vector<8x192xf32> to vector<8x64xf32>
    %48 = vector.extract_strided_slice %39 {offsets = [0, 192], sizes = [8, 64], strides = [1, 1]} : vector<8x256xf32> to vector<8x64xf32>
    %49 = arith.mulf %46, %27 : vector<8x64xf32>
    %50 = arith.mulf %45, %48 : vector<8x64xf32>
    %51 = arith.addf %49, %50 : vector<8x64xf32>
    %52 = math.tanh %51 : vector<8x64xf32>
    %53 = arith.mulf %47, %52 : vector<8x64xf32>
    %c1 = arith.constant 1 : index
    %c0_27 = arith.constant 0 : index
    %c0_28 = arith.constant 0 : index
    %54 = vector.load %arg5[%c1, %c0_27, %c0_28] : memref<14x1x64xf32, #tpu.memory_space<vmem>>, vector<1x1x64xf32>
    %55 = vector.shape_cast %54 : vector<1x1x64xf32> to vector<1x64xf32>
    %56 = vector.broadcast %55 : vector<1x64xf32> to vector<8x64xf32>
    %57 = arith.mulf %53, %56 : vector<8x64xf32>
    %58 = arith.addf %34, %57 : vector<8x64xf32>
    %c16 = arith.constant 16 : index
    %c0_29 = arith.constant 0 : index
    %59 = vector.load %arg8[%c16, %c0_29] : memref<112x256xf32, #tpu.memory_space<vmem>>, vector<8x256xf32>
    %c0_30 = arith.constant 0 : index
    %c0_31 = arith.constant 0 : index
    %60 = vector.load %arg4[%c0_30, %c0_31] : memref<64x256xf32, #tpu.memory_space<vmem>>, vector<64x256xf32>
    %cst_32 = arith.constant dense<0.000000e+00> : vector<8x256xf32>
    %61 = tpu.matmul %53, %60, %cst_32 {dimension_numbers = #tpu.dot_dimension_numbers<[1], [0], [0], [1], [0, 0, 1, 1], [], []>} : vector<8x64xf32>, vector<64x256xf32>, vector<8x256xf32> -> vector<8x256xf32>
    %62 = arith.addf %59, %61 : vector<8x256xf32>
    %63 = math.tanh %62 : vector<8x256xf32>
    %64 = vector.extract_strided_slice %63 {offsets = [0, 0], sizes = [8, 192], strides = [1, 1]} : vector<8x256xf32> to vector<8x192xf32>
    %cst_33 = arith.constant 5.000000e-01 : f32
    %65 = vector.broadcast %cst_33 : f32 to vector<8x192xf32>
    %66 = arith.mulf %65, %64 : vector<8x192xf32>
    %cst_34 = arith.constant 5.000000e-01 : f32
    %67 = vector.broadcast %cst_34 : f32 to vector<8x192xf32>
    %68 = arith.addf %66, %67 : vector<8x192xf32>
    %69 = vector.extract_strided_slice %68 {offsets = [0, 0], sizes = [8, 64], strides = [1, 1]} : vector<8x192xf32> to vector<8x64xf32>
    %70 = vector.extract_strided_slice %68 {offsets = [0, 64], sizes = [8, 64], strides = [1, 1]} : vector<8x192xf32> to vector<8x64xf32>
    %71 = vector.extract_strided_slice %68 {offsets = [0, 128], sizes = [8, 64], strides = [1, 1]} : vector<8x192xf32> to vector<8x64xf32>
    %72 = vector.extract_strided_slice %63 {offsets = [0, 192], sizes = [8, 64], strides = [1, 1]} : vector<8x256xf32> to vector<8x64xf32>
    %73 = arith.mulf %70, %51 : vector<8x64xf32>
    %74 = arith.mulf %69, %72 : vector<8x64xf32>
    %75 = arith.addf %73, %74 : vector<8x64xf32>
    %76 = math.tanh %75 : vector<8x64xf32>
    %77 = arith.mulf %71, %76 : vector<8x64xf32>
    %c2 = arith.constant 2 : index
    %c0_35 = arith.constant 0 : index
    %c0_36 = arith.constant 0 : index
    %78 = vector.load %arg5[%c2, %c0_35, %c0_36] : memref<14x1x64xf32, #tpu.memory_space<vmem>>, vector<1x1x64xf32>
    %79 = vector.shape_cast %78 : vector<1x1x64xf32> to vector<1x64xf32>
    %80 = vector.broadcast %79 : vector<1x64xf32> to vector<8x64xf32>
    %81 = arith.mulf %77, %80 : vector<8x64xf32>
    %82 = arith.addf %58, %81 : vector<8x64xf32>
    %c24 = arith.constant 24 : index
    %c0_37 = arith.constant 0 : index
    %83 = vector.load %arg8[%c24, %c0_37] : memref<112x256xf32, #tpu.memory_space<vmem>>, vector<8x256xf32>
    %c0_38 = arith.constant 0 : index
    %c0_39 = arith.constant 0 : index
    %84 = vector.load %arg4[%c0_38, %c0_39] : memref<64x256xf32, #tpu.memory_space<vmem>>, vector<64x256xf32>
    %cst_40 = arith.constant dense<0.000000e+00> : vector<8x256xf32>
    %85 = tpu.matmul %77, %84, %cst_40 {dimension_numbers = #tpu.dot_dimension_numbers<[1], [0], [0], [1], [0, 0, 1, 1], [], []>} : vector<8x64xf32>, vector<64x256xf32>, vector<8x256xf32> -> vector<8x256xf32>
    %86 = arith.addf %83, %85 : vector<8x256xf32>
    %87 = math.tanh %86 : vector<8x256xf32>
    %88 = vector.extract_strided_slice %87 {offsets = [0, 0], sizes = [8, 192], strides = [1, 1]} : vector<8x256xf32> to vector<8x192xf32>
    %cst_41 = arith.constant 5.000000e-01 : f32
    %89 = vector.broadcast %cst_41 : f32 to vector<8x192xf32>
    %90 = arith.mulf %89, %88 : vector<8x192xf32>
    %cst_42 = arith.constant 5.000000e-01 : f32
    %91 = vector.broadcast %cst_42 : f32 to vector<8x192xf32>
    %92 = arith.addf %90, %91 : vector<8x192xf32>
    %93 = vector.extract_strided_slice %92 {offsets = [0, 0], sizes = [8, 64], strides = [1, 1]} : vector<8x192xf32> to vector<8x64xf32>
    %94 = vector.extract_strided_slice %92 {offsets = [0, 64], sizes = [8, 64], strides = [1, 1]} : vector<8x192xf32> to vector<8x64xf32>
    %95 = vector.extract_strided_slice %92 {offsets = [0, 128], sizes = [8, 64], strides = [1, 1]} : vector<8x192xf32> to vector<8x64xf32>
    %96 = vector.extract_strided_slice %87 {offsets = [0, 192], sizes = [8, 64], strides = [1, 1]} : vector<8x256xf32> to vector<8x64xf32>
    %97 = arith.mulf %94, %75 : vector<8x64xf32>
    %98 = arith.mulf %93, %96 : vector<8x64xf32>
    %99 = arith.addf %97, %98 : vector<8x64xf32>
    %100 = math.tanh %99 : vector<8x64xf32>
    %101 = arith.mulf %95, %100 : vector<8x64xf32>
    %c3 = arith.constant 3 : index
    %c0_43 = arith.constant 0 : index
    %c0_44 = arith.constant 0 : index
    %102 = vector.load %arg5[%c3, %c0_43, %c0_44] : memref<14x1x64xf32, #tpu.memory_space<vmem>>, vector<1x1x64xf32>
    %103 = vector.shape_cast %102 : vector<1x1x64xf32> to vector<1x64xf32>
    %104 = vector.broadcast %103 : vector<1x64xf32> to vector<8x64xf32>
    %105 = arith.mulf %101, %104 : vector<8x64xf32>
    %106 = arith.addf %82, %105 : vector<8x64xf32>
    %c32 = arith.constant 32 : index
    %c0_45 = arith.constant 0 : index
    %107 = vector.load %arg8[%c32, %c0_45] : memref<112x256xf32, #tpu.memory_space<vmem>>, vector<8x256xf32>
    %c0_46 = arith.constant 0 : index
    %c0_47 = arith.constant 0 : index
    %108 = vector.load %arg4[%c0_46, %c0_47] : memref<64x256xf32, #tpu.memory_space<vmem>>, vector<64x256xf32>
    %cst_48 = arith.constant dense<0.000000e+00> : vector<8x256xf32>
    %109 = tpu.matmul %101, %108, %cst_48 {dimension_numbers = #tpu.dot_dimension_numbers<[1], [0], [0], [1], [0, 0, 1, 1], [], []>} : vector<8x64xf32>, vector<64x256xf32>, vector<8x256xf32> -> vector<8x256xf32>
    %110 = arith.addf %107, %109 : vector<8x256xf32>
    %111 = math.tanh %110 : vector<8x256xf32>
    %112 = vector.extract_strided_slice %111 {offsets = [0, 0], sizes = [8, 192], strides = [1, 1]} : vector<8x256xf32> to vector<8x192xf32>
    %cst_49 = arith.constant 5.000000e-01 : f32
    %113 = vector.broadcast %cst_49 : f32 to vector<8x192xf32>
    %114 = arith.mulf %113, %112 : vector<8x192xf32>
    %cst_50 = arith.constant 5.000000e-01 : f32
    %115 = vector.broadcast %cst_50 : f32 to vector<8x192xf32>
    %116 = arith.addf %114, %115 : vector<8x192xf32>
    %117 = vector.extract_strided_slice %116 {offsets = [0, 0], sizes = [8, 64], strides = [1, 1]} : vector<8x192xf32> to vector<8x64xf32>
    %118 = vector.extract_strided_slice %116 {offsets = [0, 64], sizes = [8, 64], strides = [1, 1]} : vector<8x192xf32> to vector<8x64xf32>
    %119 = vector.extract_strided_slice %116 {offsets = [0, 128], sizes = [8, 64], strides = [1, 1]} : vector<8x192xf32> to vector<8x64xf32>
    %120 = vector.extract_strided_slice %111 {offsets = [0, 192], sizes = [8, 64], strides = [1, 1]} : vector<8x256xf32> to vector<8x64xf32>
    %121 = arith.mulf %118, %99 : vector<8x64xf32>
    %122 = arith.mulf %117, %120 : vector<8x64xf32>
    %123 = arith.addf %121, %122 : vector<8x64xf32>
    %124 = math.tanh %123 : vector<8x64xf32>
    %125 = arith.mulf %119, %124 : vector<8x64xf32>
    %c4 = arith.constant 4 : index
    %c0_51 = arith.constant 0 : index
    %c0_52 = arith.constant 0 : index
    %126 = vector.load %arg5[%c4, %c0_51, %c0_52] : memref<14x1x64xf32, #tpu.memory_space<vmem>>, vector<1x1x64xf32>
    %127 = vector.shape_cast %126 : vector<1x1x64xf32> to vector<1x64xf32>
    %128 = vector.broadcast %127 : vector<1x64xf32> to vector<8x64xf32>
    %129 = arith.mulf %125, %128 : vector<8x64xf32>
    %130 = arith.addf %106, %129 : vector<8x64xf32>
    %c40 = arith.constant 40 : index
    %c0_53 = arith.constant 0 : index
    %131 = vector.load %arg8[%c40, %c0_53] : memref<112x256xf32, #tpu.memory_space<vmem>>, vector<8x256xf32>
    %c0_54 = arith.constant 0 : index
    %c0_55 = arith.constant 0 : index
    %132 = vector.load %arg4[%c0_54, %c0_55] : memref<64x256xf32, #tpu.memory_space<vmem>>, vector<64x256xf32>
    %cst_56 = arith.constant dense<0.000000e+00> : vector<8x256xf32>
    %133 = tpu.matmul %125, %132, %cst_56 {dimension_numbers = #tpu.dot_dimension_numbers<[1], [0], [0], [1], [0, 0, 1, 1], [], []>} : vector<8x64xf32>, vector<64x256xf32>, vector<8x256xf32> -> vector<8x256xf32>
    %134 = arith.addf %131, %133 : vector<8x256xf32>
    %135 = math.tanh %134 : vector<8x256xf32>
    %136 = vector.extract_strided_slice %135 {offsets = [0, 0], sizes = [8, 192], strides = [1, 1]} : vector<8x256xf32> to vector<8x192xf32>
    %cst_57 = arith.constant 5.000000e-01 : f32
    %137 = vector.broadcast %cst_57 : f32 to vector<8x192xf32>
    %138 = arith.mulf %137, %136 : vector<8x192xf32>
    %cst_58 = arith.constant 5.000000e-01 : f32
    %139 = vector.broadcast %cst_58 : f32 to vector<8x192xf32>
    %140 = arith.addf %138, %139 : vector<8x192xf32>
    %141 = vector.extract_strided_slice %140 {offsets = [0, 0], sizes = [8, 64], strides = [1, 1]} : vector<8x192xf32> to vector<8x64xf32>
    %142 = vector.extract_strided_slice %140 {offsets = [0, 64], sizes = [8, 64], strides = [1, 1]} : vector<8x192xf32> to vector<8x64xf32>
    %143 = vector.extract_strided_slice %140 {offsets = [0, 128], sizes = [8, 64], strides = [1, 1]} : vector<8x192xf32> to vector<8x64xf32>
    %144 = vector.extract_strided_slice %135 {offsets = [0, 192], sizes = [8, 64], strides = [1, 1]} : vector<8x256xf32> to vector<8x64xf32>
    %145 = arith.mulf %142, %123 : vector<8x64xf32>
    %146 = arith.mulf %141, %144 : vector<8x64xf32>
    %147 = arith.addf %145, %146 : vector<8x64xf32>
    %148 = math.tanh %147 : vector<8x64xf32>
    %149 = arith.mulf %143, %148 : vector<8x64xf32>
    %c5 = arith.constant 5 : index
    %c0_59 = arith.constant 0 : index
    %c0_60 = arith.constant 0 : index
    %150 = vector.load %arg5[%c5, %c0_59, %c0_60] : memref<14x1x64xf32, #tpu.memory_space<vmem>>, vector<1x1x64xf32>
    %151 = vector.shape_cast %150 : vector<1x1x64xf32> to vector<1x64xf32>
    %152 = vector.broadcast %151 : vector<1x64xf32> to vector<8x64xf32>
    %153 = arith.mulf %149, %152 : vector<8x64xf32>
    %154 = arith.addf %130, %153 : vector<8x64xf32>
    %c48 = arith.constant 48 : index
    %c0_61 = arith.constant 0 : index
    %155 = vector.load %arg8[%c48, %c0_61] : memref<112x256xf32, #tpu.memory_space<vmem>>, vector<8x256xf32>
    %c0_62 = arith.constant 0 : index
    %c0_63 = arith.constant 0 : index
    %156 = vector.load %arg4[%c0_62, %c0_63] : memref<64x256xf32, #tpu.memory_space<vmem>>, vector<64x256xf32>
    %cst_64 = arith.constant dense<0.000000e+00> : vector<8x256xf32>
    %157 = tpu.matmul %149, %156, %cst_64 {dimension_numbers = #tpu.dot_dimension_numbers<[1], [0], [0], [1], [0, 0, 1, 1], [], []>} : vector<8x64xf32>, vector<64x256xf32>, vector<8x256xf32> -> vector<8x256xf32>
    %158 = arith.addf %155, %157 : vector<8x256xf32>
    %159 = math.tanh %158 : vector<8x256xf32>
    %160 = vector.extract_strided_slice %159 {offsets = [0, 0], sizes = [8, 192], strides = [1, 1]} : vector<8x256xf32> to vector<8x192xf32>
    %cst_65 = arith.constant 5.000000e-01 : f32
    %161 = vector.broadcast %cst_65 : f32 to vector<8x192xf32>
    %162 = arith.mulf %161, %160 : vector<8x192xf32>
    %cst_66 = arith.constant 5.000000e-01 : f32
    %163 = vector.broadcast %cst_66 : f32 to vector<8x192xf32>
    %164 = arith.addf %162, %163 : vector<8x192xf32>
    %165 = vector.extract_strided_slice %164 {offsets = [0, 0], sizes = [8, 64], strides = [1, 1]} : vector<8x192xf32> to vector<8x64xf32>
    %166 = vector.extract_strided_slice %164 {offsets = [0, 64], sizes = [8, 64], strides = [1, 1]} : vector<8x192xf32> to vector<8x64xf32>
    %167 = vector.extract_strided_slice %164 {offsets = [0, 128], sizes = [8, 64], strides = [1, 1]} : vector<8x192xf32> to vector<8x64xf32>
    %168 = vector.extract_strided_slice %159 {offsets = [0, 192], sizes = [8, 64], strides = [1, 1]} : vector<8x256xf32> to vector<8x64xf32>
    %169 = arith.mulf %166, %147 : vector<8x64xf32>
    %170 = arith.mulf %165, %168 : vector<8x64xf32>
    %171 = arith.addf %169, %170 : vector<8x64xf32>
    %172 = math.tanh %171 : vector<8x64xf32>
    %173 = arith.mulf %167, %172 : vector<8x64xf32>
    %c6 = arith.constant 6 : index
    %c0_67 = arith.constant 0 : index
    %c0_68 = arith.constant 0 : index
    %174 = vector.load %arg5[%c6, %c0_67, %c0_68] : memref<14x1x64xf32, #tpu.memory_space<vmem>>, vector<1x1x64xf32>
    %175 = vector.shape_cast %174 : vector<1x1x64xf32> to vector<1x64xf32>
    %176 = vector.broadcast %175 : vector<1x64xf32> to vector<8x64xf32>
    %177 = arith.mulf %173, %176 : vector<8x64xf32>
    %178 = arith.addf %154, %177 : vector<8x64xf32>
    %c56 = arith.constant 56 : index
    %c0_69 = arith.constant 0 : index
    %179 = vector.load %arg8[%c56, %c0_69] : memref<112x256xf32, #tpu.memory_space<vmem>>, vector<8x256xf32>
    %c0_70 = arith.constant 0 : index
    %c0_71 = arith.constant 0 : index
    %180 = vector.load %arg4[%c0_70, %c0_71] : memref<64x256xf32, #tpu.memory_space<vmem>>, vector<64x256xf32>
    %cst_72 = arith.constant dense<0.000000e+00> : vector<8x256xf32>
    %181 = tpu.matmul %173, %180, %cst_72 {dimension_numbers = #tpu.dot_dimension_numbers<[1], [0], [0], [1], [0, 0, 1, 1], [], []>} : vector<8x64xf32>, vector<64x256xf32>, vector<8x256xf32> -> vector<8x256xf32>
    %182 = arith.addf %179, %181 : vector<8x256xf32>
    %183 = math.tanh %182 : vector<8x256xf32>
    %184 = vector.extract_strided_slice %183 {offsets = [0, 0], sizes = [8, 192], strides = [1, 1]} : vector<8x256xf32> to vector<8x192xf32>
    %cst_73 = arith.constant 5.000000e-01 : f32
    %185 = vector.broadcast %cst_73 : f32 to vector<8x192xf32>
    %186 = arith.mulf %185, %184 : vector<8x192xf32>
    %cst_74 = arith.constant 5.000000e-01 : f32
    %187 = vector.broadcast %cst_74 : f32 to vector<8x192xf32>
    %188 = arith.addf %186, %187 : vector<8x192xf32>
    %189 = vector.extract_strided_slice %188 {offsets = [0, 0], sizes = [8, 64], strides = [1, 1]} : vector<8x192xf32> to vector<8x64xf32>
    %190 = vector.extract_strided_slice %188 {offsets = [0, 64], sizes = [8, 64], strides = [1, 1]} : vector<8x192xf32> to vector<8x64xf32>
    %191 = vector.extract_strided_slice %188 {offsets = [0, 128], sizes = [8, 64], strides = [1, 1]} : vector<8x192xf32> to vector<8x64xf32>
    %192 = vector.extract_strided_slice %183 {offsets = [0, 192], sizes = [8, 64], strides = [1, 1]} : vector<8x256xf32> to vector<8x64xf32>
    %193 = arith.mulf %190, %171 : vector<8x64xf32>
    %194 = arith.mulf %189, %192 : vector<8x64xf32>
    %195 = arith.addf %193, %194 : vector<8x64xf32>
    %196 = math.tanh %195 : vector<8x64xf32>
    %197 = arith.mulf %191, %196 : vector<8x64xf32>
    %c7 = arith.constant 7 : index
    %c0_75 = arith.constant 0 : index
    %c0_76 = arith.constant 0 : index
    %198 = vector.load %arg5[%c7, %c0_75, %c0_76] : memref<14x1x64xf32, #tpu.memory_space<vmem>>, vector<1x1x64xf32>
    %199 = vector.shape_cast %198 : vector<1x1x64xf32> to vector<1x64xf32>
    %200 = vector.broadcast %199 : vector<1x64xf32> to vector<8x64xf32>
    %201 = arith.mulf %197, %200 : vector<8x64xf32>
    %202 = arith.addf %178, %201 : vector<8x64xf32>
    %c64 = arith.constant 64 : index
    %c0_77 = arith.constant 0 : index
    %203 = vector.load %arg8[%c64, %c0_77] : memref<112x256xf32, #tpu.memory_space<vmem>>, vector<8x256xf32>
    %c0_78 = arith.constant 0 : index
    %c0_79 = arith.constant 0 : index
    %204 = vector.load %arg4[%c0_78, %c0_79] : memref<64x256xf32, #tpu.memory_space<vmem>>, vector<64x256xf32>
    %cst_80 = arith.constant dense<0.000000e+00> : vector<8x256xf32>
    %205 = tpu.matmul %197, %204, %cst_80 {dimension_numbers = #tpu.dot_dimension_numbers<[1], [0], [0], [1], [0, 0, 1, 1], [], []>} : vector<8x64xf32>, vector<64x256xf32>, vector<8x256xf32> -> vector<8x256xf32>
    %206 = arith.addf %203, %205 : vector<8x256xf32>
    %207 = math.tanh %206 : vector<8x256xf32>
    %208 = vector.extract_strided_slice %207 {offsets = [0, 0], sizes = [8, 192], strides = [1, 1]} : vector<8x256xf32> to vector<8x192xf32>
    %cst_81 = arith.constant 5.000000e-01 : f32
    %209 = vector.broadcast %cst_81 : f32 to vector<8x192xf32>
    %210 = arith.mulf %209, %208 : vector<8x192xf32>
    %cst_82 = arith.constant 5.000000e-01 : f32
    %211 = vector.broadcast %cst_82 : f32 to vector<8x192xf32>
    %212 = arith.addf %210, %211 : vector<8x192xf32>
    %213 = vector.extract_strided_slice %212 {offsets = [0, 0], sizes = [8, 64], strides = [1, 1]} : vector<8x192xf32> to vector<8x64xf32>
    %214 = vector.extract_strided_slice %212 {offsets = [0, 64], sizes = [8, 64], strides = [1, 1]} : vector<8x192xf32> to vector<8x64xf32>
    %215 = vector.extract_strided_slice %212 {offsets = [0, 128], sizes = [8, 64], strides = [1, 1]} : vector<8x192xf32> to vector<8x64xf32>
    %216 = vector.extract_strided_slice %207 {offsets = [0, 192], sizes = [8, 64], strides = [1, 1]} : vector<8x256xf32> to vector<8x64xf32>
    %217 = arith.mulf %214, %195 : vector<8x64xf32>
    %218 = arith.mulf %213, %216 : vector<8x64xf32>
    %219 = arith.addf %217, %218 : vector<8x64xf32>
    %220 = math.tanh %219 : vector<8x64xf32>
    %221 = arith.mulf %215, %220 : vector<8x64xf32>
    %c8_83 = arith.constant 8 : index
    %c0_84 = arith.constant 0 : index
    %c0_85 = arith.constant 0 : index
    %222 = vector.load %arg5[%c8_83, %c0_84, %c0_85] : memref<14x1x64xf32, #tpu.memory_space<vmem>>, vector<1x1x64xf32>
    %223 = vector.shape_cast %222 : vector<1x1x64xf32> to vector<1x64xf32>
    %224 = vector.broadcast %223 : vector<1x64xf32> to vector<8x64xf32>
    %225 = arith.mulf %221, %224 : vector<8x64xf32>
    %226 = arith.addf %202, %225 : vector<8x64xf32>
    %c72 = arith.constant 72 : index
    %c0_86 = arith.constant 0 : index
    %227 = vector.load %arg8[%c72, %c0_86] : memref<112x256xf32, #tpu.memory_space<vmem>>, vector<8x256xf32>
    %c0_87 = arith.constant 0 : index
    %c0_88 = arith.constant 0 : index
    %228 = vector.load %arg4[%c0_87, %c0_88] : memref<64x256xf32, #tpu.memory_space<vmem>>, vector<64x256xf32>
    %cst_89 = arith.constant dense<0.000000e+00> : vector<8x256xf32>
    %229 = tpu.matmul %221, %228, %cst_89 {dimension_numbers = #tpu.dot_dimension_numbers<[1], [0], [0], [1], [0, 0, 1, 1], [], []>} : vector<8x64xf32>, vector<64x256xf32>, vector<8x256xf32> -> vector<8x256xf32>
    %230 = arith.addf %227, %229 : vector<8x256xf32>
    %231 = math.tanh %230 : vector<8x256xf32>
    %232 = vector.extract_strided_slice %231 {offsets = [0, 0], sizes = [8, 192], strides = [1, 1]} : vector<8x256xf32> to vector<8x192xf32>
    %cst_90 = arith.constant 5.000000e-01 : f32
    %233 = vector.broadcast %cst_90 : f32 to vector<8x192xf32>
    %234 = arith.mulf %233, %232 : vector<8x192xf32>
    %cst_91 = arith.constant 5.000000e-01 : f32
    %235 = vector.broadcast %cst_91 : f32 to vector<8x192xf32>
    %236 = arith.addf %234, %235 : vector<8x192xf32>
    %237 = vector.extract_strided_slice %236 {offsets = [0, 0], sizes = [8, 64], strides = [1, 1]} : vector<8x192xf32> to vector<8x64xf32>
    %238 = vector.extract_strided_slice %236 {offsets = [0, 64], sizes = [8, 64], strides = [1, 1]} : vector<8x192xf32> to vector<8x64xf32>
    %239 = vector.extract_strided_slice %236 {offsets = [0, 128], sizes = [8, 64], strides = [1, 1]} : vector<8x192xf32> to vector<8x64xf32>
    %240 = vector.extract_strided_slice %231 {offsets = [0, 192], sizes = [8, 64], strides = [1, 1]} : vector<8x256xf32> to vector<8x64xf32>
    %241 = arith.mulf %238, %219 : vector<8x64xf32>
    %242 = arith.mulf %237, %240 : vector<8x64xf32>
    %243 = arith.addf %241, %242 : vector<8x64xf32>
    %244 = math.tanh %243 : vector<8x64xf32>
    %245 = arith.mulf %239, %244 : vector<8x64xf32>
    %c9 = arith.constant 9 : index
    %c0_92 = arith.constant 0 : index
    %c0_93 = arith.constant 0 : index
    %246 = vector.load %arg5[%c9, %c0_92, %c0_93] : memref<14x1x64xf32, #tpu.memory_space<vmem>>, vector<1x1x64xf32>
    %247 = vector.shape_cast %246 : vector<1x1x64xf32> to vector<1x64xf32>
    %248 = vector.broadcast %247 : vector<1x64xf32> to vector<8x64xf32>
    %249 = arith.mulf %245, %248 : vector<8x64xf32>
    %250 = arith.addf %226, %249 : vector<8x64xf32>
    %c80 = arith.constant 80 : index
    %c0_94 = arith.constant 0 : index
    %251 = vector.load %arg8[%c80, %c0_94] : memref<112x256xf32, #tpu.memory_space<vmem>>, vector<8x256xf32>
    %c0_95 = arith.constant 0 : index
    %c0_96 = arith.constant 0 : index
    %252 = vector.load %arg4[%c0_95, %c0_96] : memref<64x256xf32, #tpu.memory_space<vmem>>, vector<64x256xf32>
    %cst_97 = arith.constant dense<0.000000e+00> : vector<8x256xf32>
    %253 = tpu.matmul %245, %252, %cst_97 {dimension_numbers = #tpu.dot_dimension_numbers<[1], [0], [0], [1], [0, 0, 1, 1], [], []>} : vector<8x64xf32>, vector<64x256xf32>, vector<8x256xf32> -> vector<8x256xf32>
    %254 = arith.addf %251, %253 : vector<8x256xf32>
    %255 = math.tanh %254 : vector<8x256xf32>
    %256 = vector.extract_strided_slice %255 {offsets = [0, 0], sizes = [8, 192], strides = [1, 1]} : vector<8x256xf32> to vector<8x192xf32>
    %cst_98 = arith.constant 5.000000e-01 : f32
    %257 = vector.broadcast %cst_98 : f32 to vector<8x192xf32>
    %258 = arith.mulf %257, %256 : vector<8x192xf32>
    %cst_99 = arith.constant 5.000000e-01 : f32
    %259 = vector.broadcast %cst_99 : f32 to vector<8x192xf32>
    %260 = arith.addf %258, %259 : vector<8x192xf32>
    %261 = vector.extract_strided_slice %260 {offsets = [0, 0], sizes = [8, 64], strides = [1, 1]} : vector<8x192xf32> to vector<8x64xf32>
    %262 = vector.extract_strided_slice %260 {offsets = [0, 64], sizes = [8, 64], strides = [1, 1]} : vector<8x192xf32> to vector<8x64xf32>
    %263 = vector.extract_strided_slice %260 {offsets = [0, 128], sizes = [8, 64], strides = [1, 1]} : vector<8x192xf32> to vector<8x64xf32>
    %264 = vector.extract_strided_slice %255 {offsets = [0, 192], sizes = [8, 64], strides = [1, 1]} : vector<8x256xf32> to vector<8x64xf32>
    %265 = arith.mulf %262, %243 : vector<8x64xf32>
    %266 = arith.mulf %261, %264 : vector<8x64xf32>
    %267 = arith.addf %265, %266 : vector<8x64xf32>
    %268 = math.tanh %267 : vector<8x64xf32>
    %269 = arith.mulf %263, %268 : vector<8x64xf32>
    %c10 = arith.constant 10 : index
    %c0_100 = arith.constant 0 : index
    %c0_101 = arith.constant 0 : index
    %270 = vector.load %arg5[%c10, %c0_100, %c0_101] : memref<14x1x64xf32, #tpu.memory_space<vmem>>, vector<1x1x64xf32>
    %271 = vector.shape_cast %270 : vector<1x1x64xf32> to vector<1x64xf32>
    %272 = vector.broadcast %271 : vector<1x64xf32> to vector<8x64xf32>
    %273 = arith.mulf %269, %272 : vector<8x64xf32>
    %274 = arith.addf %250, %273 : vector<8x64xf32>
    %c88 = arith.constant 88 : index
    %c0_102 = arith.constant 0 : index
    %275 = vector.load %arg8[%c88, %c0_102] : memref<112x256xf32, #tpu.memory_space<vmem>>, vector<8x256xf32>
    %c0_103 = arith.constant 0 : index
    %c0_104 = arith.constant 0 : index
    %276 = vector.load %arg4[%c0_103, %c0_104] : memref<64x256xf32, #tpu.memory_space<vmem>>, vector<64x256xf32>
    %cst_105 = arith.constant dense<0.000000e+00> : vector<8x256xf32>
    %277 = tpu.matmul %269, %276, %cst_105 {dimension_numbers = #tpu.dot_dimension_numbers<[1], [0], [0], [1], [0, 0, 1, 1], [], []>} : vector<8x64xf32>, vector<64x256xf32>, vector<8x256xf32> -> vector<8x256xf32>
    %278 = arith.addf %275, %277 : vector<8x256xf32>
    %279 = math.tanh %278 : vector<8x256xf32>
    %280 = vector.extract_strided_slice %279 {offsets = [0, 0], sizes = [8, 192], strides = [1, 1]} : vector<8x256xf32> to vector<8x192xf32>
    %cst_106 = arith.constant 5.000000e-01 : f32
    %281 = vector.broadcast %cst_106 : f32 to vector<8x192xf32>
    %282 = arith.mulf %281, %280 : vector<8x192xf32>
    %cst_107 = arith.constant 5.000000e-01 : f32
    %283 = vector.broadcast %cst_107 : f32 to vector<8x192xf32>
    %284 = arith.addf %282, %283 : vector<8x192xf32>
    %285 = vector.extract_strided_slice %284 {offsets = [0, 0], sizes = [8, 64], strides = [1, 1]} : vector<8x192xf32> to vector<8x64xf32>
    %286 = vector.extract_strided_slice %284 {offsets = [0, 64], sizes = [8, 64], strides = [1, 1]} : vector<8x192xf32> to vector<8x64xf32>
    %287 = vector.extract_strided_slice %284 {offsets = [0, 128], sizes = [8, 64], strides = [1, 1]} : vector<8x192xf32> to vector<8x64xf32>
    %288 = vector.extract_strided_slice %279 {offsets = [0, 192], sizes = [8, 64], strides = [1, 1]} : vector<8x256xf32> to vector<8x64xf32>
    %289 = arith.mulf %286, %267 : vector<8x64xf32>
    %290 = arith.mulf %285, %288 : vector<8x64xf32>
    %291 = arith.addf %289, %290 : vector<8x64xf32>
    %292 = math.tanh %291 : vector<8x64xf32>
    %293 = arith.mulf %287, %292 : vector<8x64xf32>
    %c11 = arith.constant 11 : index
    %c0_108 = arith.constant 0 : index
    %c0_109 = arith.constant 0 : index
    %294 = vector.load %arg5[%c11, %c0_108, %c0_109] : memref<14x1x64xf32, #tpu.memory_space<vmem>>, vector<1x1x64xf32>
    %295 = vector.shape_cast %294 : vector<1x1x64xf32> to vector<1x64xf32>
    %296 = vector.broadcast %295 : vector<1x64xf32> to vector<8x64xf32>
    %297 = arith.mulf %293, %296 : vector<8x64xf32>
    %298 = arith.addf %274, %297 : vector<8x64xf32>
    %c96 = arith.constant 96 : index
    %c0_110 = arith.constant 0 : index
    %299 = vector.load %arg8[%c96, %c0_110] : memref<112x256xf32, #tpu.memory_space<vmem>>, vector<8x256xf32>
    %c0_111 = arith.constant 0 : index
    %c0_112 = arith.constant 0 : index
    %300 = vector.load %arg4[%c0_111, %c0_112] : memref<64x256xf32, #tpu.memory_space<vmem>>, vector<64x256xf32>
    %cst_113 = arith.constant dense<0.000000e+00> : vector<8x256xf32>
    %301 = tpu.matmul %293, %300, %cst_113 {dimension_numbers = #tpu.dot_dimension_numbers<[1], [0], [0], [1], [0, 0, 1, 1], [], []>} : vector<8x64xf32>, vector<64x256xf32>, vector<8x256xf32> -> vector<8x256xf32>
    %302 = arith.addf %299, %301 : vector<8x256xf32>
    %303 = math.tanh %302 : vector<8x256xf32>
    %304 = vector.extract_strided_slice %303 {offsets = [0, 0], sizes = [8, 192], strides = [1, 1]} : vector<8x256xf32> to vector<8x192xf32>
    %cst_114 = arith.constant 5.000000e-01 : f32
    %305 = vector.broadcast %cst_114 : f32 to vector<8x192xf32>
    %306 = arith.mulf %305, %304 : vector<8x192xf32>
    %cst_115 = arith.constant 5.000000e-01 : f32
    %307 = vector.broadcast %cst_115 : f32 to vector<8x192xf32>
    %308 = arith.addf %306, %307 : vector<8x192xf32>
    %309 = vector.extract_strided_slice %308 {offsets = [0, 0], sizes = [8, 64], strides = [1, 1]} : vector<8x192xf32> to vector<8x64xf32>
    %310 = vector.extract_strided_slice %308 {offsets = [0, 64], sizes = [8, 64], strides = [1, 1]} : vector<8x192xf32> to vector<8x64xf32>
    %311 = vector.extract_strided_slice %308 {offsets = [0, 128], sizes = [8, 64], strides = [1, 1]} : vector<8x192xf32> to vector<8x64xf32>
    %312 = vector.extract_strided_slice %303 {offsets = [0, 192], sizes = [8, 64], strides = [1, 1]} : vector<8x256xf32> to vector<8x64xf32>
    %313 = arith.mulf %310, %291 : vector<8x64xf32>
    %314 = arith.mulf %309, %312 : vector<8x64xf32>
    %315 = arith.addf %313, %314 : vector<8x64xf32>
    %316 = math.tanh %315 : vector<8x64xf32>
    %317 = arith.mulf %311, %316 : vector<8x64xf32>
    %c12 = arith.constant 12 : index
    %c0_116 = arith.constant 0 : index
    %c0_117 = arith.constant 0 : index
    %318 = vector.load %arg5[%c12, %c0_116, %c0_117] : memref<14x1x64xf32, #tpu.memory_space<vmem>>, vector<1x1x64xf32>
    %319 = vector.shape_cast %318 : vector<1x1x64xf32> to vector<1x64xf32>
    %320 = vector.broadcast %319 : vector<1x64xf32> to vector<8x64xf32>
    %321 = arith.mulf %317, %320 : vector<8x64xf32>
    %322 = arith.addf %298, %321 : vector<8x64xf32>
    %c104 = arith.constant 104 : index
    %c0_118 = arith.constant 0 : index
    %323 = vector.load %arg8[%c104, %c0_118] : memref<112x256xf32, #tpu.memory_space<vmem>>, vector<8x256xf32>
    %c0_119 = arith.constant 0 : index
    %c0_120 = arith.constant 0 : index
    %324 = vector.load %arg4[%c0_119, %c0_120] : memref<64x256xf32, #tpu.memory_space<vmem>>, vector<64x256xf32>
    %cst_121 = arith.constant dense<0.000000e+00> : vector<8x256xf32>
    %325 = tpu.matmul %317, %324, %cst_121 {dimension_numbers = #tpu.dot_dimension_numbers<[1], [0], [0], [1], [0, 0, 1, 1], [], []>} : vector<8x64xf32>, vector<64x256xf32>, vector<8x256xf32> -> vector<8x256xf32>
    %326 = arith.addf %323, %325 : vector<8x256xf32>
    %327 = math.tanh %326 : vector<8x256xf32>
    %328 = vector.extract_strided_slice %327 {offsets = [0, 0], sizes = [8, 192], strides = [1, 1]} : vector<8x256xf32> to vector<8x192xf32>
    %cst_122 = arith.constant 5.000000e-01 : f32
    %329 = vector.broadcast %cst_122 : f32 to vector<8x192xf32>
    %330 = arith.mulf %329, %328 : vector<8x192xf32>
    %cst_123 = arith.constant 5.000000e-01 : f32
    %331 = vector.broadcast %cst_123 : f32 to vector<8x192xf32>
    %332 = arith.addf %330, %331 : vector<8x192xf32>
    %333 = vector.extract_strided_slice %332 {offsets = [0, 0], sizes = [8, 64], strides = [1, 1]} : vector<8x192xf32> to vector<8x64xf32>
    %334 = vector.extract_strided_slice %332 {offsets = [0, 64], sizes = [8, 64], strides = [1, 1]} : vector<8x192xf32> to vector<8x64xf32>
    %335 = vector.extract_strided_slice %332 {offsets = [0, 128], sizes = [8, 64], strides = [1, 1]} : vector<8x192xf32> to vector<8x64xf32>
    %336 = vector.extract_strided_slice %327 {offsets = [0, 192], sizes = [8, 64], strides = [1, 1]} : vector<8x256xf32> to vector<8x64xf32>
    %337 = arith.mulf %334, %315 : vector<8x64xf32>
    %338 = arith.mulf %333, %336 : vector<8x64xf32>
    %339 = arith.addf %337, %338 : vector<8x64xf32>
    %340 = math.tanh %339 : vector<8x64xf32>
    %341 = arith.mulf %335, %340 : vector<8x64xf32>
    %c13 = arith.constant 13 : index
    %c0_124 = arith.constant 0 : index
    %c0_125 = arith.constant 0 : index
    %342 = vector.load %arg5[%c13, %c0_124, %c0_125] : memref<14x1x64xf32, #tpu.memory_space<vmem>>, vector<1x1x64xf32>
    %343 = vector.shape_cast %342 : vector<1x1x64xf32> to vector<1x64xf32>
    %344 = vector.broadcast %343 : vector<1x64xf32> to vector<8x64xf32>
    %345 = arith.mulf %341, %344 : vector<8x64xf32>
    %346 = arith.addf %322, %345 : vector<8x64xf32>
    %cst_126 = arith.constant dense<0.000000e+00> : vector<8xf32>
    %347 = vector.multi_reduction <add>, %346, %cst_126 [1] : vector<8x64xf32> to vector<8xf32>
    %348 = vector.shape_cast %347 : vector<8xf32> to vector<8x1xf32>
    %c0_127 = arith.constant 0 : index
    %c0_128 = arith.constant 0 : index
    %349 = vector.load %arg6[%c0_127, %c0_128] : memref<1x1xf32, #tpu.memory_space<vmem>>, vector<1x1xf32>
    %350 = vector.broadcast %349 : vector<1x1xf32> to vector<8x1xf32>
    %351 = arith.addf %348, %350 : vector<8x1xf32>
    %c0_129 = arith.constant 0 : index
    %c0_130 = arith.constant 0 : index
    %c0_131 = arith.constant 0 : index
    %352 = vector.load %arg7[%c0_129, %c0_130, %c0_131] : memref<1x8x1xf32, #tpu.memory_space<vmem>>, vector<1x8x1xf32>
    %353 = vector.shape_cast %352 : vector<1x8x1xf32> to vector<8x1xf32>
    %354 = vector.shape_cast %351 : vector<8x1xf32> to vector<1x8x1xf32>
    tpu.vector_store %arg7[%c0_129, %c0_130, %c0_131], %354 {strides = array<i32>} : memref<1x8x1xf32, #tpu.memory_space<vmem>>, vector<1x8x1xf32>,
    return
  }
  func.func @transform_0(%arg0: i32) -> (i32, i32, i32) {
    %c0_i32 = arith.constant 0 : i32
    %c0_i32_0 = arith.constant 0 : i32
    %c0_i32_1 = arith.constant 0 : i32
    return %arg0, %c0_i32, %c0_i32_0 : i32, i32, i32
  }
  func.func @transform_1(%arg0: i32) -> (i32, i32) {
    %c0_i32 = arith.constant 0 : i32
    %c0_i32_0 = arith.constant 0 : i32
    %c0_i32_1 = arith.constant 0 : i32
    return %c0_i32, %c0_i32_0 : i32, i32
  }
  func.func @transform_2(%arg0: i32) -> (i32, i32) {
    %c0_i32 = arith.constant 0 : i32
    %c0_i32_0 = arith.constant 0 : i32
    %c0_i32_1 = arith.constant 0 : i32
    return %c0_i32, %c0_i32_0 : i32, i32
  }
  func.func @transform_3(%arg0: i32) -> (i32, i32) {
    %c0_i32 = arith.constant 0 : i32
    %c0_i32_0 = arith.constant 0 : i32
    %c0_i32_1 = arith.constant 0 : i32
    return %c0_i32, %c0_i32_0 : i32, i32
  }
  func.func @transform_4(%arg0: i32) -> (i32, i32, i32) {
    %c0_i32 = arith.constant 0 : i32
    %c0_i32_0 = arith.constant 0 : i32
    %c0_i32_1 = arith.constant 0 : i32
    %c0_i32_2 = arith.constant 0 : i32
    return %c0_i32, %c0_i32_0, %c0_i32_1 : i32, i32, i32
  }
  func.func @transform_5(%arg0: i32) -> (i32, i32) {
    %c0_i32 = arith.constant 0 : i32
    %c0_i32_0 = arith.constant 0 : i32
    %c0_i32_1 = arith.constant 0 : i32
    return %c0_i32, %c0_i32_0 : i32, i32
  }
  func.func @transform_6(%arg0: i32) -> (i32, i32, i32) {
    %c0_i32 = arith.constant 0 : i32
    %c0_i32_0 = arith.constant 0 : i32
    %c0_i32_1 = arith.constant 0 : i32
    return %arg0, %c0_i32, %c0_i32_0 : i32, i32, i32
  }
}

</mosaic_0001>

<bundles_post_ra>
// kernel: convrnn_forward.1
= control target key start
LH: loop header
LB: loop body
LE: loop exit
PB: predicated region body
PF: predicated region fallthrough
CT: control target
= control target key end

     0   :  { %v2289_v3 = vmov 0.0   ;;  %vm57_vm0 = vcmask 195584   ;;  %v47_v57 = vlaneseq  ;;  %s2290_s19 = smov 64   ;;  %vm295_vm1 = vcmask 523264   ;;  %s2792_s1 = inlined_call_operand.vmem [shape: f32[24,256], index: 1, kind: input, shape index: {}]   ;;  %s2793_s3 = inlined_call_operand.vmem [shape: f32[64,256], index: 3, kind: input, shape index: {}]   ;;  %s2794_s0 = inlined_call_operand.vmem [shape: f32[1,112,24], index: 0, kind: input, shape index: {}]   ;;  %s2795_s2 = inlined_call_operand.vmem [shape: f32[1,256], index: 2, kind: input, shape index: {}]   ;;  %s2796_s4 = inlined_call_operand.vmem [shape: f32[14,1,64], index: 4, kind: input, shape index: {}]   ;;  %s2797_s5 = inlined_call_operand.<no memory space> [shape: f32[1,1], index: 5, kind: input, shape index: {}]   ;;  %s2798_s6 = inlined_call_operand.vmem [shape: f32[1,8,1], index: 6, kind: output, shape index: {}]  }
   0x1   :  { %v40_v0 = vld [vmem:[%s2792_s1 + $0x8] sm:$0xff]  ;;  %v42_v1 = vld [vmem:[%s2792_s1 + $0x18] sm:$0xff]  ;;  %v39_v2 = vld [vmem:[%s2792_s1] sm:$0xff]  ;;  %164 = vmatprep.mubr.f32.mxu1 %v2289_v3  ;;  %1028 = vmatprep.mubr.f32.mxu0 %v2289_v3  ;;  %vm1858_vm2 = vcmask 7168  }
   0x2   :  { %v1919_v4 = vpack.c.bf16 %v42_v1, %v40_v0  ;;  %v41_v5 = vld [vmem:[%s2792_s1 + $0x10] sm:$0xff]  ;;  %v44_v7 = vld [vmem:[%s2792_s1 + $0x28] sm:$0xff]  ;;  %v282_v9 = vld [vmem:[%s2793_s3 + $0x18] sm:$0xff]  ;;  %v48_v60 = vshrl.u32 %v47_v57, 7 }
   0x3   :  { %v1921_v6 = vpack.c.bf16 %v41_v5, %v39_v2  ;;  %v280_v8 = vld [vmem:[%s2793_s3 + $0x8] sm:$0xff]  ;;  %v279_v11 = vld [vmem:[%s2793_s3] sm:$0xff]  ;;  %v281_v12 = vld [vmem:[%s2793_s3 + $0x10] sm:$0xff] }
   0x4   :  { %1920 = vmatprep.subr.bf16.mxu1 %v1919_v4  ;;  %v2349_v10 = vpack.c.bf16 %v282_v9, %v280_v8  ;;  %v2357_v13 = vpack.c.bf16 %v281_v12, %v279_v11  ;;  %v284_v14 = vld [vmem:[%s2793_s3 + $0x28] sm:$0xff]  ;;  %v43_v15 = vld [vmem:[%s2792_s1 + $0x20] sm:$0xff]  ;;  %v286_v16 = vld [vmem:[%s2793_s3 + $0x38] sm:$0xff]  ;;  %v53_v63 = vsub.s32 1, %v48_v60  ;;  %v49_v9 = vsub.s32 0, %v48_v60 }
   0x5   :  { %1922 = vmatpush1.bf16.msra.mxu1 %v1921_v6  ;;  %v25_v17 = vld [vmem:[%s2794_s0] sm:$0xff]  ;;  %v2372_v18 = vpack.c.bf16 %v286_v16, %v284_v14  ;;  %v285_v20 = vld [vmem:[%s2793_s3 + $0x30] sm:$0xff]  ;;  %v288_v21 = vld [vmem:[%s2793_s3 + $0x48] sm:$0xff] }
   0x6   :  { %104 = vmatprep.subr.mxu1 %v44_v7  ;;  %2020 = vmatprep.subr.bf16.mxu0 %v2349_v10  ;;  %v283_v19 = vld [vmem:[%s2793_s3 + $0x20] sm:$0xff]  ;;  %v290_v22 = vld [vmem:[%s2793_s3 + $0x58] sm:$0xff]  ;;  %v26_v24 = vld [vmem:[%s2794_s0 + $0x8] sm:$0xff] }
   0x7   :  { %2022 = vmatpush1.bf16.msra.mxu0 %v2357_v13  ;;  %v2390_v23 = vpack.c.bf16 %v285_v20, %v283_v19  ;;  %v2397_v25 = vpack.c.bf16 %v290_v22, %v288_v21  ;;  %v287_v26 = vld [vmem:[%s2793_s3 + $0x40] sm:$0xff]  ;;  %v289_v27 = vld [vmem:[%s2793_s3 + $0x50] sm:$0xff]  ;;  %v292_v28 = vld [vmem:[%s2793_s3 + $0x68] sm:$0xff] }
   0x8   :  { %2024 = vmatprep.subr.bf16.mxu0 %v2372_v18  ;;  %v294_v29 = vld [vmem:[%s2793_s3 + $0x78] sm:$0xff]  ;;  %v2415_v30 = vpack.c.bf16 %v289_v27, %v287_v26  ;;  %v27_v31 = vld [vmem:[%s2794_s0 + $0x10] sm:$0xff]  ;;  %v291_v33 = vld [vmem:[%s2793_s3 + $0x60] sm:$0xff] }
   0x9   :  { %105 = vmatpush1.msra.mxu1 %v43_v15  ;;  %v2422_v32 = vpack.c.bf16 %v294_v29, %v292_v28  ;;  %v293_v34 = vld [vmem:[%s2793_s3 + $0x70] sm:$0xff]  ;;  %v28_v36 = vld [vmem:[%s2794_s0 + $0x18] sm:$0xff]  ;;  %v29_v37 = vld [vmem:[%s2794_s0 + $0x20] sm:$0xff] }
   0xa   :  { %1864 = vmatmul.mubr.msk.f32.vlgmr.msra.gmra.mrb[0].mxu1 %vm57_vm0, %v25_v17  ;;  %1924 = vmatprep.subr.bf16.mxu1 %v2349_v10  ;;  %v2434_v35 = vpack.c.bf16 %v293_v34, %v291_v33  ;;  %v30_v38 = vld [vmem:[%s2794_s0 + $0x28] sm:$0xff]  ;;  %v31_v39 = vld [vmem:[%s2794_s0 + $0x30] sm:$0xff]  ;;  %v32_v40 = vld [vmem:[%s2794_s0 + $0x38] sm:$0xff] }
   0xb   :  { %1926 = vmatpush1.bf16.msra.mxu1 %v2357_v13  ;;  %170 = vmatprep.mubr.f32.mxu1 %v2289_v3  ;;  %v33_v41 = vld [vmem:[%s2794_s0 + $0x40] sm:$0xff]  ;;  %v34_v42 = vld [vmem:[%s2794_s0 + $0x48] sm:$0xff]  ;;  %v35_v43 = vld [vmem:[%s2794_s0 + $0x50] sm:$0xff] }
   0xc   :  { %1928 = vmatprep.subr.bf16.mxu1 %v2372_v18  ;;  %2026 = vmatpush1.bf16.msra.mxu0 %v2390_v23  ;;  %v36_v44 = vld [vmem:[%s2794_s0 + $0x58] sm:$0xff]  ;;  %v37_v45 = vld [vmem:[%s2794_s0 + $0x60] sm:$0xff]  ;;  %v38_v46 = vld [vmem:[%s2794_s0 + $0x68] sm:$0xff] }
   0xd   :  { %2028 = vmatprep.subr.bf16.mxu0 %v2397_v25  ;;  %v45_v1 = vld [vmem:[%s2795_s2] sm:$0x3] }
   0xe   :  { %1865 = vmatmul.mubr.msk.f32.gmra.mrb[2].mxu1 %vm57_vm0, %v26_v24  ;;  %v2543_v4 = vrot.slane %v45_v1, %v53_v63  ;;  %v2547_v11 = vrot.slane %v45_v1, %v49_v9  ;;  %v1878_v63 = vld [vmem:[%s2796_s4] ss:$0 sm:$0xff]  ;;  %v1881_v1 = vld [vmem:[%s2796_s4 + $0x1] ss:$0 sm:$0xff] }
   0xf   :  { %176 = vmatprep.mubr.f32.mxu1 %v2289_v3  ;;  %1930 = vmatpush1.bf16.msra.mxu1 %v2390_v23 }
  0x10   :  { %1932 = vmatprep.subr.bf16.mxu1 %v2397_v25  ;;  %2030 = vmatpush1.bf16.msra.mxu0 %v2415_v30 }
  0x11   :  { %2032 = vmatprep.subr.bf16.mxu0 %v2422_v32 }
  0x12   :  { %1866 = vmatmul.mubr.msk.f32.gmra.mrb[4].mxu1 %vm57_vm0, %v27_v31 }
  0x13   :  { %182 = vmatprep.mubr.f32.mxu1 %v2289_v3  ;;  %1934 = vmatpush1.bf16.msra.mxu1 %v2415_v30 }
  0x14   :  { %1936 = vmatprep.subr.bf16.mxu1 %v2422_v32  ;;  %2034 = vmatpush1.bf16.msra.mxu0 %v2434_v35 }
  0x15   :  { %2036 = vmatprep.subr.bf16.mxu0 %v2349_v10 }
  0x16   :  { %1867 = vmatmul.mubr.msk.f32.gmra.mrb[6].mxu1 %vm57_vm0, %v28_v36 }
  0x17   :  { %188 = vmatprep.mubr.f32.mxu1 %v2289_v3  ;;  %1938 = vmatpush1.bf16.msra.mxu1 %v2434_v35 }
  0x18   :  { %1940 = vmatprep.subr.bf16.mxu1 %v2349_v10 }
  0x1a   :  { %1868 = vmatmul.mubr.msk.f32.gmra.mrb[8].mxu1 %vm57_vm0, %v29_v37 }
  0x1b   :  { %194 = vmatprep.mubr.f32.mxu1 %v2289_v3 }
  0x1e   :  { %1869 = vmatmul.mubr.msk.f32.gmra.mrb[10].mxu1 %vm57_vm0, %v30_v38 }
  0x1f   :  { %200 = vmatprep.mubr.f32.mxu1 %v2289_v3 }
  0x22   :  { %1870 = vmatmul.mubr.msk.f32.gmra.mrb[12].mxu1 %vm57_vm0, %v31_v39 }
  0x23   :  { %206 = vmatprep.mubr.f32.mxu1 %v2289_v3 }
  0x26   :  { %1871 = vmatmul.mubr.msk.f32.gmra.mrb[14].mxu1 %vm57_vm0, %v32_v40 }
  0x27   :  { %212 = vmatprep.mubr.f32.mxu1 %v2289_v3 }
  0x2a   :  { %1872 = vmatmul.mubr.msk.f32.gmra.mrb[16].mxu1 %vm57_vm0, %v33_v41 }
  0x2b   :  { %218 = vmatprep.mubr.f32.mxu1 %v2289_v3 }
  0x2e   :  { %1873 = vmatmul.mubr.msk.f32.gmra.mrb[18].mxu1 %vm57_vm0, %v34_v42 }
  0x2f   :  { %224 = vmatprep.mubr.f32.mxu1 %v2289_v3 }
  0x32   :  { %1874 = vmatmul.mubr.msk.f32.gmra.mrb[20].mxu1 %vm57_vm0, %v35_v43 }
  0x33   :  { %230 = vmatprep.mubr.f32.mxu1 %v2289_v3 }
  0x36   :  { %1875 = vmatmul.mubr.msk.f32.gmra.mrb[22].mxu1 %vm57_vm0, %v36_v44 }
  0x37   :  { %236 = vmatprep.mubr.f32.mxu1 %v2289_v3 }
  0x3a   :  { %1876 = vmatmul.mubr.msk.f32.gmra.mrb[24].mxu1 %vm57_vm0, %v37_v45 }
  0x3b   :  { %242 = vmatprep.mubr.f32.mxu1 %v2289_v3 }
  0x3e   :  { %1877 = vmatmul.mubr.msk.f32.gmra.mrb[26].mxu1 %vm57_vm0, %v38_v46 }
  0x3f   :  { %363 = vmatprep.mubr.f32.mxu1 %v2289_v3 }
  0x42   :  { %364 = vmatmul.mubr.f32.vlgmr.msra.gmra.mrb[0].mxu1 %v2289_v3 }
  0x43   :  { %1942 = vmatpush1.bf16.msra.mxu1 %v2357_v13  ;;  %473 = vmatprep.mubr.f32.mxu1 %v2289_v3 }
  0x44   :  { %1944 = vmatprep.subr.bf16.mxu1 %v2372_v18 }
  0x47   :  { %1946 = vmatpush1.bf16.msra.mxu1 %v2390_v23 }
  0x48   :  { %1948 = vmatprep.subr.bf16.mxu1 %v2397_v25 }
  0x4b   :  { %1950 = vmatpush1.bf16.msra.mxu1 %v2415_v30 }
  0x4c   :  { %1952 = vmatprep.subr.bf16.mxu1 %v2422_v32 }
  0x4f   :  { %1954 = vmatpush1.bf16.msra.mxu1 %v2434_v35 }
  0x50   :  { %1956 = vmatprep.subr.bf16.mxu1 %v2349_v10 }
  0xf5   :  { %v2508_v47 = vpop.f32.mrb[12].mxu1 }
  0xf6   :  { %v2510_v48 = vpop.f32.mrb[13].mxu1 }
  0xf9   :  { %v2512_v49 = vpop.f32.mrb[14].mxu1 }
  0xfa   :  { %v2514_v50 = vpop.f32.mrb[15].mxu1 }
  0xfd   :  { %v2516_v51 = vpop.f32.mrb[16].mxu1 }
  0xfe   :  { %v2518_v52 = vpop.f32.mrb[17].mxu1 }
 0x101   :  { %v2520_v53 = vpop.f32.mrb[18].mxu1 }
 0x102   :  { %v2522_v54 = vpop.f32.mrb[19].mxu1 }
 0x105   :  { %v2524_v55 = vpop.f32.mrb[20].mxu1 }
 0x106   :  { %v2526_v56 = vpop.f32.mrb[21].mxu1 }
 0x109   :  { %v2528_v58 = vpop.f32.mrb[22].mxu1 }
 0x10a   :  { %v2530_v59 = vpop.f32.mrb[23].mxu1 }
 0x10d   :  { %v2532_v61 = vpop.f32.mrb[24].mxu1 }
 0x10e   :  { %v2534_v62 = vpop.f32.mrb[25].mxu1 }
 0x111   :  { %v2536_v0 = vpop.f32.mrb[26].mxu1 }
 0x112   :  { %v2541_v2 = vpop.f32.mrb[27].mxu1 }
 0x115   :  { %v365_v5 = vpop.f32.mrb[0].mxu1 }
 0x116   :  { %v367_v6 = vpop.f32.mrb[1].mxu1  ;;  %v2147_v12 = vadd.f32 %v365_v5, %v2547_v11 }
 0x117   :  { %v2148_v7 = vadd.f32 %v367_v6, %v2543_v4 }
 0x119   :  { %2205 = vtanh.f32 %v2148_v7 }
 0x11a   :  { %2207 = vtanh.f32 %v2147_v12 }
 0x123   :  { %v2206_v8 = vpop.eup %2205 }
 0x124   :  { %380 = vrot.lane.b32.xlu0 %v2206_v8, %s2290_s19  ;;  %v2208_v14 = vpop.eup %2207  ;;  %v375_v26 = vmul.f32 0.5, %v2206_v8 }
 0x125   :  { %v374_v15 = vmul.f32 0.5, %v2208_v14 }
 0x126   :  { %v377_v27 = vadd.f32 0.5, %v375_v26 }
 0x127   :  { %v376_v16 = vadd.f32 0.5, %v374_v15 }
 0x129   :  { %v378_v20 = vmul.f32 0.0, %v376_v16 }
 0x196   :  { %v381_v17 = vpop.permute.xlu0 %380 }
 0x197   :  { %v383_v19 = vmul.f32 %v381_v17, %v376_v16 }
 0x199   :  { %385 = vrot.lane.b32.xlu0 %v383_v19, %s2290_s19 }
 0x20b   :  { %v386_v21 = vpop.permute.xlu0 %385 }
 0x20c   :  { %v388_v22 = vadd.f32 %v386_v21, %v378_v20 }
 0x20e   :  { %2209 = vtanh.f32 %v388_v22 }
 0x218   :  { %v2210_v24 = vpop.eup %2209 }
 0x219   :  { %391 = vrot.lane.b32.xlu1 %v2210_v24, %s2290_s19 }
 0x28b   :  { %v392_v28 = vpop.permute.xlu1 %391 }
 0x28c   :  { %v394_v29 = vmul.f32 %v392_v28, %v377_v27 }
 0x28e   :  { %1879 = vmatmul.mubr.msk.f32.vlgmr.msra.gmra.mrb[2].mxu1 %vm295_vm1, %v394_v29  ;;  %v402_v7 = vmul.f32 %v1878_v63, %v394_v29 }
 0x28f   :  { %1958 = vmatpush1.bf16.msra.mxu1 %v2357_v13  ;;  %584 = vmatprep.mubr.f32.mxu1 %v2289_v3 }
 0x290   :  { %1960 = vmatprep.subr.bf16.mxu1 %v2372_v18 }
 0x293   :  { %1962 = vmatpush1.bf16.msra.mxu1 %v2390_v23 }
 0x294   :  { %1964 = vmatprep.subr.bf16.mxu1 %v2397_v25 }
 0x297   :  { %1966 = vmatpush1.bf16.msra.mxu1 %v2415_v30 }
 0x298   :  { %1968 = vmatprep.subr.bf16.mxu1 %v2422_v32 }
 0x29b   :  { %1970 = vmatpush1.bf16.msra.mxu1 %v2434_v35 }
 0x29c   :  { %1972 = vmatprep.subr.bf16.mxu1 %v2349_v10 }
 0x361   :  { %v475_v31 = vpop.f32.mrb[2].mxu1 }
 0x362   :  { %v477_v33 = vpop.f32.mrb[3].mxu1  ;;  %v2149_v37 = vadd.f32 %v475_v31, %v2547_v11 }
 0x363   :  { %v2150_v34 = vadd.f32 %v477_v33, %v2543_v4 }
 0x365   :  { %2211 = vtanh.f32 %v2150_v34  ;;  %v1884_v34 = vld [vmem:[%s2796_s4 + $0x2] ss:$0 sm:$0xff] }
 0x366   :  { %2213 = vtanh.f32 %v2149_v37 }
 0x36f   :  { %v2212_v36 = vpop.eup %2211 }
 0x370   :  { %490 = vrot.lane.b32.xlu1 %v2212_v36, %s2290_s19  ;;  %v2214_v38 = vpop.eup %2213  ;;  %v485_v57 = vmul.f32 0.5, %v2212_v36 }
 0x371   :  { %v484_v39 = vmul.f32 0.5, %v2214_v38 }
 0x372   :  { %v487_v60 = vadd.f32 0.5, %v485_v57 }
 0x373   :  { %v486_v40 = vadd.f32 0.5, %v484_v39 }
 0x375   :  { %v488_v43 = vmul.f32 %v486_v40, %v388_v22 }
 0x3e2   :  { %v491_v41 = vpop.permute.xlu1 %490 }
 0x3e3   :  { %v493_v42 = vmul.f32 %v491_v41, %v486_v40 }
 0x3e5   :  { %495 = vrot.lane.b32.xlu0 %v493_v42, %s2290_s19 }
 0x457   :  { %v496_v44 = vpop.permute.xlu0 %495 }
 0x458   :  { %v498_v45 = vadd.f32 %v496_v44, %v488_v43 }
 0x45a   :  { %2215 = vtanh.f32 %v498_v45 }
 0x464   :  { %v2216_v46 = vpop.eup %2215 }
 0x465   :  { %501 = vrot.lane.b32.xlu1 %v2216_v46, %s2290_s19 }
 0x4d7   :  { %v502_v5 = vpop.permute.xlu1 %501 }
 0x4d8   :  { %v504_v6 = vmul.f32 %v502_v5, %v487_v60 }
 0x4da   :  { %v513_v8 = vmul.f32 %v1881_v1, %v504_v6  ;;  %1882 = vmatmul.mubr.msk.f32.vlgmr.msra.gmra.mrb[4].mxu1 %vm295_vm1, %v504_v6 }
 0x4db   :  { %1974 = vmatpush1.bf16.msra.mxu1 %v2357_v13  ;;  %695 = vmatprep.mubr.f32.mxu1 %v2289_v3 }
 0x4dc   :  { %v514_v9 = vadd.f32 %v513_v8, %v402_v7  ;;  %1976 = vmatprep.subr.bf16.mxu1 %v2372_v18 }
 0x4df   :  { %1978 = vmatpush1.bf16.msra.mxu1 %v2390_v23 }
 0x4e0   :  { %1980 = vmatprep.subr.bf16.mxu1 %v2397_v25 }
 0x4e3   :  { %1982 = vmatpush1.bf16.msra.mxu1 %v2415_v30 }
 0x4e4   :  { %1984 = vmatprep.subr.bf16.mxu1 %v2422_v32 }
 0x4e7   :  { %1986 = vmatpush1.bf16.msra.mxu1 %v2434_v35 }
 0x4e8   :  { %1988 = vmatprep.subr.bf16.mxu1 %v2349_v10 }
 0x5ad   :  { %v586_v12 = vpop.f32.mrb[4].mxu1 }
 0x5ae   :  { %v588_v14 = vpop.f32.mrb[5].mxu1  ;;  %v2151_v17 = vadd.f32 %v586_v12, %v2547_v11  ;;  %v1887_v12 = vld [vmem:[%s2796_s4 + $0x3] ss:$0 sm:$0xff] }
 0x5af   :  { %v2152_v15 = vadd.f32 %v588_v14, %v2543_v4 }
 0x5b1   :  { %2217 = vtanh.f32 %v2152_v15 }
 0x5b2   :  { %2219 = vtanh.f32 %v2151_v17 }
 0x5bb   :  { %v2218_v16 = vpop.eup %2217 }
 0x5bc   :  { %601 = vrot.lane.b32.xlu0 %v2218_v16, %s2290_s19  ;;  %v2220_v19 = vpop.eup %2219  ;;  %v596_v31 = vmul.f32 0.5, %v2218_v16 }
 0x5bd   :  { %v595_v20 = vmul.f32 0.5, %v2220_v19 }
 0x5be   :  { %v598_v33 = vadd.f32 0.5, %v596_v31 }
 0x5bf   :  { %v597_v21 = vadd.f32 0.5, %v595_v20 }
 0x5c1   :  { %v599_v26 = vmul.f32 %v597_v21, %v498_v45 }
 0x62e   :  { %v602_v22 = vpop.permute.xlu0 %601 }
 0x62f   :  { %v604_v24 = vmul.f32 %v602_v22, %v597_v21 }
 0x631   :  { %606 = vrot.lane.b32.xlu1 %v604_v24, %s2290_s19 }
 0x6a3   :  { %v607_v27 = vpop.permute.xlu1 %606 }
 0x6a4   :  { %v609_v28 = vadd.f32 %v607_v27, %v599_v26 }
 0x6a6   :  { %2221 = vtanh.f32 %v609_v28 }
 0x6b0   :  { %v2222_v29 = vpop.eup %2221 }
 0x6b1   :  { %612 = vrot.lane.b32.xlu0 %v2222_v29, %s2290_s19 }
 0x723   :  { %v613_v36 = vpop.permute.xlu0 %612 }
 0x724   :  { %v615_v37 = vmul.f32 %v613_v36, %v598_v33 }
 0x726   :  { %v624_v38 = vmul.f32 %v1884_v34, %v615_v37  ;;  %1885 = vmatmul.mubr.msk.f32.vlgmr.msra.gmra.mrb[6].mxu1 %vm295_vm1, %v615_v37 }
 0x727   :  { %1990 = vmatpush1.bf16.msra.mxu1 %v2357_v13  ;;  %806 = vmatprep.mubr.f32.mxu1 %v2289_v3 }
 0x728   :  { %v625_v39 = vadd.f32 %v624_v38, %v514_v9  ;;  %1992 = vmatprep.subr.bf16.mxu1 %v2372_v18 }
 0x72b   :  { %1994 = vmatpush1.bf16.msra.mxu1 %v2390_v23 }
 0x72c   :  { %1996 = vmatprep.subr.bf16.mxu1 %v2397_v25 }
 0x72f   :  { %1998 = vmatpush1.bf16.msra.mxu1 %v2415_v30 }
 0x730   :  { %2000 = vmatprep.subr.bf16.mxu1 %v2422_v32 }
 0x733   :  { %2002 = vmatpush1.bf16.msra.mxu1 %v2434_v35 }
 0x734   :  { %2004 = vmatprep.subr.bf16.mxu1 %v2349_v10 }
 0x7f9   :  { %v697_v40 = vpop.f32.mrb[6].mxu1 }
 0x7fa   :  { %v699_v41 = vpop.f32.mrb[7].mxu1  ;;  %v2153_v44 = vadd.f32 %v697_v40, %v2547_v11  ;;  %v1890_v40 = vld [vmem:[%s2796_s4 + $0x4] ss:$0 sm:$0xff] }
 0x7fb   :  { %v2154_v42 = vadd.f32 %v699_v41, %v2543_v4 }
 0x7fd   :  { %2223 = vtanh.f32 %v2154_v42 }
 0x7fe   :  { %2225 = vtanh.f32 %v2153_v44 }
 0x807   :  { %v2224_v43 = vpop.eup %2223 }
 0x808   :  { %712 = vrot.lane.b32.xlu1 %v2224_v43, %s2290_s19  ;;  %v2226_v45 = vpop.eup %2225  ;;  %v707_v8 = vmul.f32 0.5, %v2224_v43 }
 0x809   :  { %v706_v46 = vmul.f32 0.5, %v2226_v45 }
 0x80a   :  { %v709_v9 = vadd.f32 0.5, %v707_v8 }
 0x80b   :  { %v708_v57 = vadd.f32 0.5, %v706_v46 }
 0x80d   :  { %v710_v1 = vmul.f32 %v708_v57, %v609_v28 }
 0x87a   :  { %v713_v60 = vpop.permute.xlu1 %712 }
 0x87b   :  { %v715_v63 = vmul.f32 %v713_v60, %v708_v57 }
 0x87d   :  { %717 = vrot.lane.b32.xlu0 %v715_v63, %s2290_s19 }
 0x8ef   :  { %v718_v5 = vpop.permute.xlu0 %717 }
 0x8f0   :  { %v720_v6 = vadd.f32 %v718_v5, %v710_v1 }
 0x8f2   :  { %2227 = vtanh.f32 %v720_v6 }
 0x8fc   :  { %v2228_v7 = vpop.eup %2227 }
 0x8fd   :  { %723 = vrot.lane.b32.xlu1 %v2228_v7, %s2290_s19 }
 0x96f   :  { %v724_v14 = vpop.permute.xlu1 %723 }
 0x970   :  { %v726_v15 = vmul.f32 %v724_v14, %v709_v9 }
 0x972   :  { %v735_v16 = vmul.f32 %v1887_v12, %v726_v15  ;;  %1888 = vmatmul.mubr.msk.f32.vlgmr.msra.gmra.mrb[8].mxu1 %vm295_vm1, %v726_v15 }
 0x973   :  { %2006 = vmatpush1.bf16.msra.mxu1 %v2357_v13  ;;  %917 = vmatprep.mubr.f32.mxu1 %v2289_v3 }
 0x974   :  { %v736_v17 = vadd.f32 %v735_v16, %v625_v39  ;;  %2008 = vmatprep.subr.bf16.mxu1 %v2372_v18 }
 0x977   :  { %2010 = vmatpush1.bf16.msra.mxu1 %v2390_v23 }
 0x978   :  { %2012 = vmatprep.subr.bf16.mxu1 %v2397_v25 }
 0x97b   :  { %2014 = vmatpush1.bf16.msra.mxu1 %v2415_v30 }
 0x97c   :  { %2016 = vmatprep.subr.bf16.mxu1 %v2422_v32 }
 0x97f   :  { %2018 = vmatpush1.bf16.msra.mxu1 %v2434_v35 }
 0xa45   :  { %v808_v19 = vpop.f32.mrb[8].mxu1 }
 0xa46   :  { %v810_v20 = vpop.f32.mrb[9].mxu1  ;;  %v2155_v24 = vadd.f32 %v808_v19, %v2547_v11  ;;  %v1893_v19 = vld [vmem:[%s2796_s4 + $0x5] ss:$0 sm:$0xff] }
 0xa47   :  { %v2156_v21 = vadd.f32 %v810_v20, %v2543_v4 }
 0xa49   :  { %2229 = vtanh.f32 %v2156_v21 }
 0xa4a   :  { %2231 = vtanh.f32 %v2155_v24 }
 0xa53   :  { %v2230_v22 = vpop.eup %2229 }
 0xa54   :  { %823 = vrot.lane.b32.xlu0 %v2230_v22, %s2290_s19  ;;  %v2232_v26 = vpop.eup %2231  ;;  %v818_v38 = vmul.f32 0.5, %v2230_v22 }
 0xa55   :  { %v817_v27 = vmul.f32 0.5, %v2232_v26  ;;  %v203_v26 = vadd.f32 %v2508_v47, %v2547_v11 }
 0xa56   :  { %v820_v39 = vadd.f32 0.5, %v818_v38 }
 0xa57   :  { %v819_v28 = vadd.f32 0.5, %v817_v27  ;;  %v205_v27 = vadd.f32 %v2510_v48, %v2543_v4 }
 0xa59   :  { %v821_v33 = vmul.f32 %v819_v28, %v720_v6 }
 0xac6   :  { %v824_v29 = vpop.permute.xlu0 %823 }
 0xac7   :  { %v826_v31 = vmul.f32 %v824_v29, %v819_v28 }
 0xac9   :  { %828 = vrot.lane.b32.xlu1 %v826_v31, %s2290_s19 }
 0xb3b   :  { %v829_v34 = vpop.permute.xlu1 %828 }
 0xb3c   :  { %v831_v36 = vadd.f32 %v829_v34, %v821_v33 }
 0xb3e   :  { %2233 = vtanh.f32 %v831_v36 }
 0xb48   :  { %v2234_v37 = vpop.eup %2233 }
 0xb49   :  { %834 = vrot.lane.b32.xlu0 %v2234_v37, %s2290_s19 }
 0xbbb   :  { %v835_v41 = vpop.permute.xlu0 %834 }
 0xbbc   :  { %v837_v42 = vmul.f32 %v835_v41, %v820_v39 }
 0xbbe   :  { %v846_v43 = vmul.f32 %v1890_v40, %v837_v42  ;;  %1891 = vmatmul.mubr.msk.f32.vlgmr.msra.gmra.mrb[10].mxu1 %vm295_vm1, %v837_v42 }
 0xbc0   :  { %v847_v44 = vadd.f32 %v846_v43, %v736_v17 }
 0xc91   :  { %v919_v45 = vpop.f32.mrb[10].mxu1 }
 0xc92   :  { %v921_v46 = vpop.f32.mrb[11].mxu1  ;;  %v2157_v63 = vadd.f32 %v919_v45, %v2547_v11  ;;  %v1896_v45 = vld [vmem:[%s2796_s4 + $0x6] ss:$0 sm:$0xff] }
 0xc93   :  { %v2158_v57 = vadd.f32 %v921_v46, %v2543_v4 }
 0xc95   :  { %2235 = vtanh.f32 %v2158_v57 }
 0xc96   :  { %2237 = vtanh.f32 %v2157_v63 }
 0xc9f   :  { %v2236_v60 = vpop.eup %2235 }
 0xca0   :  { %934 = vrot.lane.b32.xlu1 %v2236_v60, %s2290_s19  ;;  %v2238_v1 = vpop.eup %2237  ;;  %v929_v16 = vmul.f32 0.5, %v2236_v60 }
 0xca1   :  { %v928_v5 = vmul.f32 0.5, %v2238_v1  ;;  %v209_v1 = vadd.f32 %v2512_v49, %v2547_v11 }
 0xca2   :  { %v931_v17 = vadd.f32 0.5, %v929_v16 }
 0xca3   :  { %v930_v6 = vadd.f32 0.5, %v928_v5  ;;  %v211_v5 = vadd.f32 %v2514_v50, %v2543_v4 }
 0xca5   :  { %v932_v9 = vmul.f32 %v930_v6, %v831_v36 }
 0xd12   :  { %v935_v7 = vpop.permute.xlu1 %934 }
 0xd13   :  { %v937_v8 = vmul.f32 %v935_v7, %v930_v6 }
 0xd15   :  { %939 = vrot.lane.b32.xlu0 %v937_v8, %s2290_s19 }
 0xd87   :  { %v940_v12 = vpop.permute.xlu0 %939 }
 0xd88   :  { %v942_v14 = vadd.f32 %v940_v12, %v932_v9 }
 0xd8a   :  { %2239 = vtanh.f32 %v942_v14 }
 0xd94   :  { %v2240_v15 = vpop.eup %2239 }
 0xd95   :  { %945 = vrot.lane.b32.xlu1 %v2240_v15, %s2290_s19 }
 0xe07   :  { %v946_v20 = vpop.permute.xlu1 %945 }
 0xe08   :  { %v948_v21 = vmul.f32 %v946_v20, %v931_v17 }
 0xe0a   :  { %v957_v22 = vmul.f32 %v1893_v19, %v948_v21  ;;  %1894 = vmatmul.mubr.msk.f32.vlgmr.msra.gmra.mrb[0].mxu0 %vm295_vm1, %v948_v21 }
 0xe0b   :  { %2038 = vmatpush1.bf16.msra.mxu0 %v2357_v13  ;;  %1139 = vmatprep.mubr.f32.mxu0 %v2289_v3 }
 0xe0c   :  { %v958_v24 = vadd.f32 %v957_v22, %v847_v44  ;;  %2040 = vmatprep.subr.bf16.mxu0 %v2372_v18 }
 0xe0f   :  { %2042 = vmatpush1.bf16.msra.mxu0 %v2390_v23 }
 0xe10   :  { %2044 = vmatprep.subr.bf16.mxu0 %v2397_v25 }
 0xe13   :  { %2046 = vmatpush1.bf16.msra.mxu0 %v2415_v30 }
 0xe14   :  { %2048 = vmatprep.subr.bf16.mxu0 %v2422_v32 }
 0xe17   :  { %2050 = vmatpush1.bf16.msra.mxu0 %v2434_v35 }
 0xe18   :  { %2052 = vmatprep.subr.bf16.mxu0 %v2349_v10 }
 0xedd   :  { %v1030_v28 = vpop.f32.mrb[0].mxu0 }
 0xede   :  { %v1035_v29 = vadd.f32 %v1030_v28, %v203_v26  ;;  %v1032_v31 = vpop.f32.mrb[1].mxu0  ;;  %v1899_v26 = vld [vmem:[%s2796_s4 + $0x7] ss:$0 sm:$0xff] }
 0xedf   :  { %v1036_v33 = vadd.f32 %v1032_v31, %v205_v27 }
 0xee1   :  { %2241 = vtanh.f32 %v1036_v33  ;;  %v215_v33 = vadd.f32 %v2516_v51, %v2547_v11 }
 0xee2   :  { %2243 = vtanh.f32 %v1035_v29 }
 0xeeb   :  { %v2242_v34 = vpop.eup %2241 }
 0xeec   :  { %1045 = vrot.lane.b32.xlu0 %v2242_v34, %s2290_s19  ;;  %v2244_v36 = vpop.eup %2243  ;;  %v1040_v43 = vmul.f32 0.5, %v2242_v34  ;;  %v217_v34 = vadd.f32 %v2518_v52, %v2543_v4 }
 0xeed   :  { %v1039_v37 = vmul.f32 0.5, %v2244_v36 }
 0xeee   :  { %v1042_v44 = vadd.f32 0.5, %v1040_v43 }
 0xeef   :  { %v1041_v38 = vadd.f32 0.5, %v1039_v37 }
 0xef1   :  { %v1043_v47 = vmul.f32 %v1041_v38, %v942_v14 }
 0xf5e   :  { %v1046_v39 = vpop.permute.xlu0 %1045 }
 0xf5f   :  { %v1048_v40 = vmul.f32 %v1046_v39, %v1041_v38 }
 0xf61   :  { %1050 = vrot.lane.b32.xlu1 %v1048_v40, %s2290_s19 }
 0xfd3   :  { %v1051_v41 = vpop.permute.xlu1 %1050 }
 0xfd4   :  { %v1053_v42 = vadd.f32 %v1051_v41, %v1043_v47 }
 0xfd6   :  { %2245 = vtanh.f32 %v1053_v42 }
 0xfe0   :  { %v2246_v48 = vpop.eup %2245 }
 0xfe1   :  { %1056 = vrot.lane.b32.xlu0 %v2246_v48, %s2290_s19 }
0x1053   :  { %v1057_v46 = vpop.permute.xlu0 %1056 }
0x1054   :  { %v1059_v57 = vmul.f32 %v1057_v46, %v1042_v44 }
0x1056   :  { %v1068_v60 = vmul.f32 %v1896_v45, %v1059_v57  ;;  %1897 = vmatmul.mubr.msk.f32.vlgmr.msra.gmra.mrb[2].mxu0 %vm295_vm1, %v1059_v57 }
0x1057   :  { %2054 = vmatpush1.bf16.msra.mxu0 %v2357_v13  ;;  %1250 = vmatprep.mubr.f32.mxu0 %v2289_v3 }
0x1058   :  { %v1069_v63 = vadd.f32 %v1068_v60, %v958_v24  ;;  %2056 = vmatprep.subr.bf16.mxu0 %v2372_v18  ;;  %v1902_v60 = vld [vmem:[%s2796_s4 + $0x8] ss:$0 sm:$0xff] }
0x105b   :  { %2058 = vmatpush1.bf16.msra.mxu0 %v2390_v23 }
0x105c   :  { %2060 = vmatprep.subr.bf16.mxu0 %v2397_v25 }
0x105f   :  { %2062 = vmatpush1.bf16.msra.mxu0 %v2415_v30 }
0x1060   :  { %2064 = vmatprep.subr.bf16.mxu0 %v2422_v32 }
0x1063   :  { %2066 = vmatpush1.bf16.msra.mxu0 %v2434_v35 }
0x1064   :  { %2068 = vmatprep.subr.bf16.mxu0 %v2349_v10 }
0x1129   :  { %v1141_v6 = vpop.f32.mrb[2].mxu0 }
0x112a   :  { %v1146_v7 = vadd.f32 %v1141_v6, %v209_v1  ;;  %v1143_v8 = vpop.f32.mrb[3].mxu0 }
0x112b   :  { %v1147_v9 = vadd.f32 %v1143_v8, %v211_v5  ;;  %v223_v8 = vadd.f32 %v2522_v54, %v2543_v4 }
0x112d   :  { %2247 = vtanh.f32 %v1147_v9 }
0x112e   :  { %2249 = vtanh.f32 %v1146_v7  ;;  %v221_v7 = vadd.f32 %v2520_v53, %v2547_v11 }
0x1137   :  { %v2248_v12 = vpop.eup %2247 }
0x1138   :  { %1156 = vrot.lane.b32.xlu1 %v2248_v12, %s2290_s19  ;;  %v2250_v14 = vpop.eup %2249  ;;  %v1151_v22 = vmul.f32 0.5, %v2248_v12 }
0x1139   :  { %v1150_v15 = vmul.f32 0.5, %v2250_v14 }
0x113a   :  { %v1153_v24 = vadd.f32 0.5, %v1151_v22 }
0x113b   :  { %v1152_v16 = vadd.f32 0.5, %v1150_v15 }
0x113d   :  { %v1154_v49 = vmul.f32 %v1152_v16, %v1053_v42 }
0x11aa   :  { %v1157_v17 = vpop.permute.xlu1 %1156 }
0x11ab   :  { %v1159_v19 = vmul.f32 %v1157_v17, %v1152_v16 }
0x11ad   :  { %1161 = vrot.lane.b32.xlu0 %v1159_v19, %s2290_s19 }
0x121f   :  { %v1162_v20 = vpop.permute.xlu0 %1161 }
0x1220   :  { %v1164_v21 = vadd.f32 %v1162_v20, %v1154_v49 }
0x1222   :  { %2251 = vtanh.f32 %v1164_v21 }
0x122c   :  { %v2252_v50 = vpop.eup %2251 }
0x122d   :  { %1167 = vrot.lane.b32.xlu1 %v2252_v50, %s2290_s19 }
0x129f   :  { %v1168_v27 = vpop.permute.xlu1 %1167 }
0x12a0   :  { %v1170_v28 = vmul.f32 %v1168_v27, %v1153_v24  ;;  %v1905_v27 = vld [vmem:[%s2796_s4 + $0x9] ss:$0 sm:$0xff] }
0x12a2   :  { %v1179_v29 = vmul.f32 %v1899_v26, %v1170_v28  ;;  %1900 = vmatmul.mubr.msk.f32.vlgmr.msra.gmra.mrb[4].mxu0 %vm295_vm1, %v1170_v28 }
0x12a3   :  { %2070 = vmatpush1.bf16.msra.mxu0 %v2357_v13  ;;  %1361 = vmatprep.mubr.f32.mxu0 %v2289_v3 }
0x12a4   :  { %v1180_v31 = vadd.f32 %v1179_v29, %v1069_v63  ;;  %2072 = vmatprep.subr.bf16.mxu0 %v2372_v18 }
0x12a7   :  { %2074 = vmatpush1.bf16.msra.mxu0 %v2390_v23 }
0x12a8   :  { %2076 = vmatprep.subr.bf16.mxu0 %v2397_v25 }
0x12ab   :  { %2078 = vmatpush1.bf16.msra.mxu0 %v2415_v30 }
0x12ac   :  { %2080 = vmatprep.subr.bf16.mxu0 %v2422_v32 }
0x12af   :  { %2082 = vmatpush1.bf16.msra.mxu0 %v2434_v35 }
0x12b0   :  { %2084 = vmatprep.subr.bf16.mxu0 %v2349_v10 }
0x1375   :  { %v1252_v36 = vpop.f32.mrb[4].mxu0 }
0x1376   :  { %v1257_v37 = vadd.f32 %v1252_v36, %v215_v33  ;;  %v1254_v38 = vpop.f32.mrb[5].mxu0  ;;  %v229_v36 = vadd.f32 %v2526_v56, %v2543_v4 }
0x1377   :  { %v1258_v39 = vadd.f32 %v1254_v38, %v217_v34  ;;  %v227_v34 = vadd.f32 %v2524_v55, %v2547_v11 }
0x1379   :  { %2253 = vtanh.f32 %v1258_v39 }
0x137a   :  { %2255 = vtanh.f32 %v1257_v37 }
0x1383   :  { %v2254_v40 = vpop.eup %2253 }
0x1384   :  { %1267 = vrot.lane.b32.xlu0 %v2254_v40, %s2290_s19  ;;  %v2256_v47 = vpop.eup %2255  ;;  %v1262_v46 = vmul.f32 0.5, %v2254_v40 }
0x1385   :  { %v1261_v41 = vmul.f32 0.5, %v2256_v47 }
0x1386   :  { %v1264_v57 = vadd.f32 0.5, %v1262_v46 }
0x1387   :  { %v1263_v42 = vadd.f32 0.5, %v1261_v41 }
0x1389   :  { %v1265_v51 = vmul.f32 %v1263_v42, %v1164_v21 }
0x13f6   :  { %v1268_v48 = vpop.permute.xlu0 %1267 }
0x13f7   :  { %v1270_v43 = vmul.f32 %v1268_v48, %v1263_v42 }
0x13f9   :  { %1272 = vrot.lane.b32.xlu1 %v1270_v43, %s2290_s19 }
0x146b   :  { %v1273_v44 = vpop.permute.xlu1 %1272 }
0x146c   :  { %v1275_v45 = vadd.f32 %v1273_v44, %v1265_v51 }
0x146e   :  { %2257 = vtanh.f32 %v1275_v45 }
0x1478   :  { %v2258_v52 = vpop.eup %2257 }
0x1479   :  { %1278 = vrot.lane.b32.xlu0 %v2258_v52, %s2290_s19 }
0x14eb   :  { %v1279_v63 = vpop.permute.xlu0 %1278 }
0x14ec   :  { %v1281_v1 = vmul.f32 %v1279_v63, %v1264_v57  ;;  %v1908_v57 = vld [vmem:[%s2796_s4 + $0xa] ss:$0 sm:$0xff] }
0x14ee   :  { %v1290_v5 = vmul.f32 %v1902_v60, %v1281_v1  ;;  %1903 = vmatmul.mubr.msk.f32.vlgmr.msra.gmra.mrb[6].mxu0 %vm295_vm1, %v1281_v1 }
0x14ef   :  { %2086 = vmatpush1.bf16.msra.mxu0 %v2357_v13  ;;  %1472 = vmatprep.mubr.f32.mxu0 %v2289_v3 }
0x14f0   :  { %v1291_v6 = vadd.f32 %v1290_v5, %v1180_v31  ;;  %2088 = vmatprep.subr.bf16.mxu0 %v2372_v18 }
0x14f3   :  { %2090 = vmatpush1.bf16.msra.mxu0 %v2390_v23 }
0x14f4   :  { %2092 = vmatprep.subr.bf16.mxu0 %v2397_v25 }
0x14f7   :  { %2094 = vmatpush1.bf16.msra.mxu0 %v2415_v30 }
0x14f8   :  { %2096 = vmatprep.subr.bf16.mxu0 %v2422_v32 }
0x14fb   :  { %2098 = vmatpush1.bf16.msra.mxu0 %v2434_v35 }
0x14fc   :  { %2100 = vmatprep.subr.bf16.mxu0 %v2349_v10 }
0x15c1   :  { %v1363_v9 = vpop.f32.mrb[6].mxu0 }
0x15c2   :  { %v1368_v12 = vadd.f32 %v1363_v9, %v221_v7  ;;  %v1365_v14 = vpop.f32.mrb[7].mxu0  ;;  %v235_v7 = vadd.f32 %v2530_v59, %v2543_v4 }
0x15c3   :  { %v1369_v15 = vadd.f32 %v1365_v14, %v223_v8 }
0x15c5   :  { %2259 = vtanh.f32 %v1369_v15 }
0x15c6   :  { %2261 = vtanh.f32 %v1368_v12 }
0x15cf   :  { %v2260_v16 = vpop.eup %2259 }
0x15d0   :  { %1378 = vrot.lane.b32.xlu1 %v2260_v16, %s2290_s19  ;;  %v2262_v17 = vpop.eup %2261  ;;  %v1373_v24 = vmul.f32 0.5, %v2260_v16 }
0x15d1   :  { %v1372_v19 = vmul.f32 0.5, %v2262_v17 }
0x15d2   :  { %v1375_v26 = vadd.f32 0.5, %v1373_v24 }
0x15d3   :  { %v1374_v49 = vadd.f32 0.5, %v1372_v19 }
0x15d5   :  { %v1376_v53 = vmul.f32 %v1374_v49, %v1275_v45 }
0x1642   :  { %v1379_v20 = vpop.permute.xlu1 %1378 }
0x1643   :  { %v1381_v21 = vmul.f32 %v1379_v20, %v1374_v49 }
0x1645   :  { %1383 = vrot.lane.b32.xlu0 %v1381_v21, %s2290_s19 }
0x16b7   :  { %v1384_v50 = vpop.permute.xlu0 %1383 }
0x16b8   :  { %v1386_v22 = vadd.f32 %v1384_v50, %v1376_v53 }
0x16ba   :  { %2263 = vtanh.f32 %v1386_v22 }
0x16c4   :  { %v2264_v54 = vpop.eup %2263 }
0x16c5   :  { %1389 = vrot.lane.b32.xlu1 %v2264_v54, %s2290_s19 }
0x1737   :  { %v1390_v28 = vpop.permute.xlu1 %1389 }
0x1738   :  { %v1392_v29 = vmul.f32 %v1390_v28, %v1375_v26  ;;  %v239_v28 = vadd.f32 %v2532_v61, %v2547_v11 }
0x173a   :  { %v1401_v31 = vmul.f32 %v1905_v27, %v1392_v29  ;;  %1906 = vmatmul.mubr.msk.f32.vlgmr.msra.gmra.mrb[8].mxu0 %vm295_vm1, %v1392_v29 }
0x173b   :  { %2102 = vmatpush1.bf16.msra.mxu0 %v2357_v13  ;;  %1583 = vmatprep.mubr.f32.mxu0 %v2289_v3 }
0x173c   :  { %v1402_v33 = vadd.f32 %v1401_v31, %v1291_v6  ;;  %2104 = vmatprep.subr.bf16.mxu0 %v2372_v18  ;;  %v233_v6 = vadd.f32 %v2528_v58, %v2547_v11 }
0x173f   :  { %2106 = vmatpush1.bf16.msra.mxu0 %v2390_v23 }
0x1740   :  { %2108 = vmatprep.subr.bf16.mxu0 %v2397_v25 }
0x1743   :  { %2110 = vmatpush1.bf16.msra.mxu0 %v2415_v30 }
0x1744   :  { %2112 = vmatprep.subr.bf16.mxu0 %v2422_v32 }
0x1747   :  { %2114 = vmatpush1.bf16.msra.mxu0 %v2434_v35 }
0x1748   :  { %2116 = vmatprep.subr.bf16.mxu0 %v2349_v10 }
0x180d   :  { %v1474_v37 = vpop.f32.mrb[8].mxu0 }
0x180e   :  { %v1479_v38 = vadd.f32 %v1474_v37, %v227_v34  ;;  %v1476_v39 = vpop.f32.mrb[9].mxu0 }
0x180f   :  { %v1480_v40 = vadd.f32 %v1476_v39, %v229_v36  ;;  %v1914_v39 = vld [vmem:[%s2796_s4 + $0xc] ss:$0 sm:$0xff] }
0x1811   :  { %2265 = vtanh.f32 %v1480_v40 }
0x1812   :  { %2267 = vtanh.f32 %v1479_v38 }
0x181b   :  { %v2266_v47 = vpop.eup %2265 }
0x181c   :  { %1489 = vrot.lane.b32.xlu0 %v2266_v47, %s2290_s19  ;;  %v2268_v41 = vpop.eup %2267  ;;  %v1484_v52 = vmul.f32 0.5, %v2266_v47 }
0x181d   :  { %v1483_v42 = vmul.f32 0.5, %v2268_v41 }
0x181e   :  { %v1486_v46 = vadd.f32 0.5, %v1484_v52 }
0x181f   :  { %v1485_v48 = vadd.f32 0.5, %v1483_v42 }
0x1821   :  { %v1487_v55 = vmul.f32 %v1485_v48, %v1386_v22  ;;  %v1911_v22 = vld [vmem:[%s2796_s4 + $0xb] ss:$0 sm:$0xff] }
0x188e   :  { %v1490_v43 = vpop.permute.xlu0 %1489 }
0x188f   :  { %v1492_v51 = vmul.f32 %v1490_v43, %v1485_v48  ;;  %v245_v48 = vadd.f32 %v2536_v0, %v2547_v11  ;;  %v247_v43 = vadd.f32 %v2541_v2, %v2543_v4  ;;  %v11_v2 = vstv %s2797_s5 }
0x1890   :  { %12 = vst [vmem:[#allocation3] sm:$0x1] %v11_v2 }
0x1891   :  { %1494 = vrot.lane.b32.xlu1 %v1492_v51, %s2290_s19 }
0x1903   :  { %v1495_v44 = vpop.permute.xlu1 %1494 }
0x1904   :  { %v1497_v45 = vadd.f32 %v1495_v44, %v1487_v55 }
0x1906   :  { %2269 = vtanh.f32 %v1497_v45 }
0x1910   :  { %v2270_v56 = vpop.eup %2269 }
0x1911   :  { %1500 = vrot.lane.b32.xlu0 %v2270_v56, %s2290_s19 }
0x1983   :  { %v1501_v60 = vpop.permute.xlu0 %1500 }
0x1984   :  { %v1503_v63 = vmul.f32 %v1501_v60, %v1486_v46 }
0x1986   :  { %v1512_v1 = vmul.f32 %v1908_v57, %v1503_v63  ;;  %1909 = vmatmul.mubr.msk.f32.vlgmr.msra.gmra.mrb[10].mxu0 %vm295_vm1, %v1503_v63 }
0x1987   :  { %2118 = vmatpush1.bf16.msra.mxu0 %v2357_v13  ;;  %1694 = vmatprep.mubr.f32.mxu0 %v2289_v3 }
0x1988   :  { %v1513_v5 = vadd.f32 %v1512_v1, %v1402_v33  ;;  %2120 = vmatprep.subr.bf16.mxu0 %v2372_v18 }
0x198b   :  { %2122 = vmatpush1.bf16.msra.mxu0 %v2390_v23 }
0x198c   :  { %2124 = vmatprep.subr.bf16.mxu0 %v2397_v25 }
0x198f   :  { %2126 = vmatpush1.bf16.msra.mxu0 %v2415_v30 }
0x1990   :  { %2128 = vmatprep.subr.bf16.mxu0 %v2422_v32 }
0x1993   :  { %2130 = vmatpush1.bf16.msra.mxu0 %v2434_v35 }
0x1994   :  { %2132 = vmatprep.subr.bf16.mxu0 %v2349_v10 }
0x1a59   :  { %v1585_v8 = vpop.f32.mrb[10].mxu0 }
0x1a5a   :  { %v1590_v9 = vadd.f32 %v1585_v8, %v233_v6  ;;  %v1587_v12 = vpop.f32.mrb[11].mxu0 }
0x1a5b   :  { %v1591_v14 = vadd.f32 %v1587_v12, %v235_v7  ;;  %v1917_v7 = vld [vmem:[%s2796_s4 + $0xd] ss:$0 sm:$0xff] }
0x1a5d   :  { %2271 = vtanh.f32 %v1591_v14 }
0x1a5e   :  { %2273 = vtanh.f32 %v1590_v9 }
0x1a67   :  { %v2272_v15 = vpop.eup %2271 }
0x1a68   :  { %1600 = vrot.lane.b32.xlu1 %v2272_v15, %s2290_s19  ;;  %v2274_v16 = vpop.eup %2273  ;;  %v1595_v53 = vmul.f32 0.5, %v2272_v15 }
0x1a69   :  { %v1594_v17 = vmul.f32 0.5, %v2274_v16  ;;  %v1918_v16 = vld [vmem:[#allocation3] ss:$0 sm:$0xff] }
0x1a6a   :  { %v1597_v50 = vadd.f32 0.5, %v1595_v53 }
0x1a6b   :  { %v1596_v19 = vadd.f32 0.5, %v1594_v17 }
0x1a6d   :  { %v1598_v58 = vmul.f32 %v1596_v19, %v1497_v45 }
0x1ada   :  { %v1601_v49 = vpop.permute.xlu1 %1600 }
0x1adb   :  { %v1603_v10 = vmul.f32 %v1601_v49, %v1596_v19 }
0x1add   :  { %1605 = vrot.lane.b32.xlu0 %v1603_v10, %s2290_s19 }
0x1b4f   :  { %v1606_v20 = vpop.permute.xlu0 %1605 }
0x1b50   :  { %v1608_v21 = vadd.f32 %v1606_v20, %v1598_v58 }
0x1b52   :  { %2275 = vtanh.f32 %v1608_v21 }
0x1b5c   :  { %v2276_v59 = vpop.eup %2275 }
0x1b5d   :  { %1611 = vrot.lane.b32.xlu1 %v2276_v59, %s2290_s19 }
0x1bcf   :  { %v1612_v54 = vpop.permute.xlu1 %1611 }
0x1bd0   :  { %v1614_v24 = vmul.f32 %v1612_v54, %v1597_v50 }
0x1bd2   :  { %v1623_v26 = vmul.f32 %v1911_v22, %v1614_v24  ;;  %1912 = vmatmul.mubr.msk.f32.vlgmr.msra.gmra.mrb[12].mxu0 %vm295_vm1, %v1614_v24 }
0x1bd3   :  { %2134 = vmatpush1.bf16.msra.mxu0 %v2357_v13  ;;  %1805 = vmatprep.mubr.f32.mxu0 %v2289_v3  ;;  %v241_v13 = vadd.f32 %v2534_v62, %v2543_v4 }
0x1bd4   :  { %v1624_v27 = vadd.f32 %v1623_v26, %v1513_v5  ;;  %2136 = vmatprep.subr.bf16.mxu0 %v2372_v18 }
0x1bd7   :  { %2138 = vmatpush1.bf16.msra.mxu0 %v2390_v23 }
0x1bd8   :  { %2140 = vmatprep.subr.bf16.mxu0 %v2397_v25 }
0x1bdb   :  { %2142 = vmatpush1.bf16.msra.mxu0 %v2415_v30 }
0x1bdc   :  { %2144 = vmatprep.subr.bf16.mxu0 %v2422_v32 }
0x1bdf   :  { %2146 = vmatpush1.bf16.msra.mxu0 %v2434_v35 }
0x1ca5   :  { %v1696_v3 = vpop.f32.mrb[12].mxu0 }
0x1ca6   :  { %v1701_v29 = vadd.f32 %v1696_v3, %v239_v28  ;;  %v1698_v31 = vpop.f32.mrb[13].mxu0 }
0x1ca7   :  { %v1702_v18 = vadd.f32 %v1698_v31, %v241_v13 }
0x1ca9   :  { %2277 = vtanh.f32 %v1702_v18 }
0x1caa   :  { %2279 = vtanh.f32 %v1701_v29 }
0x1cb3   :  { %v2278_v23 = vpop.eup %2277 }
0x1cb4   :  { %1711 = vrot.lane.b32.xlu0 %v2278_v23, %s2290_s19  ;;  %v2280_v25 = vpop.eup %2279  ;;  %v1706_v37 = vmul.f32 0.5, %v2278_v23 }
0x1cb5   :  { %v1705_v30 = vmul.f32 0.5, %v2280_v25 }
0x1cb6   :  { %v1708_v38 = vadd.f32 0.5, %v1706_v37 }
0x1cb7   :  { %v1707_v32 = vadd.f32 0.5, %v1705_v30 }
0x1cb9   :  { %v1709_v61 = vmul.f32 %v1707_v32, %v1608_v21 }
0x1d26   :  { %v1712_v33 = vpop.permute.xlu0 %1711 }
0x1d27   :  { %v1714_v35 = vmul.f32 %v1712_v33, %v1707_v32 }
0x1d29   :  { %1716 = vrot.lane.b32.xlu1 %v1714_v35, %s2290_s19 }
0x1d9b   :  { %v1717_v34 = vpop.permute.xlu1 %1716 }
0x1d9c   :  { %v1719_v36 = vadd.f32 %v1717_v34, %v1709_v61 }
0x1d9e   :  { %2281 = vtanh.f32 %v1719_v36 }
0x1da8   :  { %v2282_v62 = vpop.eup %2281 }
0x1da9   :  { %1722 = vrot.lane.b32.xlu0 %v2282_v62, %s2290_s19 }
0x1e1b   :  { %v1723_v40 = vpop.permute.xlu0 %1722 }
0x1e1c   :  { %v1725_v47 = vmul.f32 %v1723_v40, %v1708_v38 }
0x1e1e   :  { %v1734_v41 = vmul.f32 %v1914_v39, %v1725_v47  ;;  %1915 = vmatmul.mubr.msk.f32.vlgmr.msra.gmra.mrb[14].mxu0 %vm295_vm1, %v1725_v47 }
0x1e20   :  { %v1735_v42 = vadd.f32 %v1734_v41, %v1624_v27 }
0x1ef1   :  { %v1807_v51 = vpop.f32.mrb[14].mxu0 }
0x1ef2   :  { %v1812_v55 = vadd.f32 %v1807_v51, %v245_v48  ;;  %v1809_v44 = vpop.f32.mrb[15].mxu0 }
0x1ef3   :  { %v1813_v45 = vadd.f32 %v1809_v44, %v247_v43 }
0x1ef5   :  { %2283 = vtanh.f32 %v1813_v45 }
0x1ef6   :  { %2285 = vtanh.f32 %v1812_v55 }
0x1eff   :  { %v2284_v56 = vpop.eup %2283 }
0x1f00   :  { %1822 = vrot.lane.b32.xlu1 %v2284_v56, %s2290_s19  ;;  %v2286_v52 = vpop.eup %2285  ;;  %v1817_v5 = vmul.f32 0.5, %v2284_v56 }
0x1f01   :  { %v1816_v46 = vmul.f32 0.5, %v2286_v52 }
0x1f02   :  { %v1819_v6 = vadd.f32 0.5, %v1817_v5 }
0x1f03   :  { %v1818_v57 = vadd.f32 0.5, %v1816_v46 }
0x1f05   :  { %v1820_v0 = vmul.f32 %v1818_v57, %v1719_v36 }
0x1f72   :  { %v1823_v60 = vpop.permute.xlu1 %1822 }
0x1f73   :  { %v1825_v63 = vmul.f32 %v1823_v60, %v1818_v57 }
0x1f75   :  { %1827 = vrot.lane.b32.xlu0 %v1825_v63, %s2290_s19 }
0x1fe7   :  { %v1828_v11 = vpop.permute.xlu0 %1827 }
0x1fe8   :  { %v1830_v1 = vadd.f32 %v1828_v11, %v1820_v0 }
0x1fea   :  { %2287 = vtanh.f32 %v1830_v1 }
0x1ff4   :  { %v2288_v4 = vpop.eup %2287 }
0x1ff5   :  { %1833 = vrot.lane.b32.xlu1 %v2288_v4, %s2290_s19 }
0x2067   :  { %v1834_v8 = vpop.permute.xlu1 %1833 }
0x2068   :  { %v1836_v9 = vmul.f32 %v1834_v8, %v1819_v6 }
0x206a   :  { %v1845_v12 = vmul.f32 %v1917_v7, %v1836_v9 }
0x206c   :  { %v1846_v14 = vadd.f32 %v1845_v12, %v1735_v42 }
0x206e   :  { %v1847_v15 = vsel %vm295_vm1, %v1846_v14, 0.0 }
0x206f   :  { %1848 = vadd.xlane.f32.xlu0 %v1847_v15 }
0x20fc   :  { %v1849_v17 = vpop.xlane.xlu0 %1848 }
0x20fd   :  { %v1857_v19 = vadd.f32 %v1918_v16, %v1849_v17 }
0x20ff   :  { %1859 = vst.msk [vmem:[%s2798_s6] sm:$0xff] %vm1858_vm2, %v1857_v19 }

</bundles_post_ra>
